<compile_context>
chip_gen: v5e
topology: v5e:2x2
jax: 0.10.0
libtpu: 0.0.40
codegen_flags: <defaults>
</compile_context>

<pallas_src>
import jax
import jax.numpy as jnp
from jax.experimental import pallas as pl
from jax.experimental.pallas import tpu as pltpu

KSIZE = 7
PAD = (KSIZE - 1) // 2
BN_EPS = 1e-5


# ------------------------------ Pallas kernel -------------------------------

def _triplet_kernel(bn_ref, ts_ref, th_ref, tw_ref, x_ref, o_ref,
                    pad_s, pad_h, pad_w):
    """Fused TripletAttention for one (1, C, H, W) NCHW batch element.

    bn_ref : SMEM f32[6]          folded inference BN (scale, shift) per gate:
                                  [SpatialGate | ChannelGateH | ChannelGateW]
    ts_ref : VMEM f32[7, 2, W, W] banded column-Toeplitz weights, SpatialGate (plane (H, W))
    th_ref : VMEM f32[7, 2, W, W] ChannelGateH   (plane (C, W))
    tw_ref : VMEM f32[7, 2, H, H] ChannelGateW^T (plane (C, H))
    x_ref  : VMEM [1, C, H, W]
    o_ref  : VMEM [1, C, H, W]
    pad_*  : VMEM f32 row-padded scratch for the (max, mean) pooled planes
    """
    x = x_ref[0]                                   # (C, H, W), native dtype
    C, H, W = x.shape

    def gate(mx, mn, t_ref, pad_ref, bn_off):
        s1, s2 = mx.shape
        # Zero only the 3-row halo (top + bottom, both channels); every step —
        # tiny, and correct under megacore grid sharding (program_id(0)==0
        # never runs on the second core, so it cannot be used as an init gate).
        pad_ref[:, 0:PAD, :] = jnp.zeros((2, PAD, s2), jnp.float32)
        pad_ref[:, PAD + s1:, :] = jnp.zeros((2, PAD, s2), jnp.float32)
        # Write the pooled planes straight into their channel slots
        # (no stack, no full-buffer zero, no full-buffer read-back).
        pad_ref[0, PAD:PAD + s1, :] = mx
        pad_ref[1, PAD:PAD + s1, :] = mn

        # 7x7 conv, 2 in channels, 1 out channel, bias=False: per row tap kh,
        # one sublane-shifted slab @ banded Toeplitz matrix on the MXU (the
        # Toeplitz folds all 7 column taps and the column zero-padding).
        acc = jnp.zeros((s1, s2), jnp.float32)
        for kh in range(KSIZE):
            slab = pad_ref[:, kh:kh + s1, :]        # (2, s1, s2)
            acc = acc + jnp.dot(slab[0], t_ref[kh, 0],
                                preferred_element_type=jnp.float32)
            acc = acc + jnp.dot(slab[1], t_ref[kh, 1],
                                preferred_element_type=jnp.float32)

        # Folded inference BatchNorm + sigmoid gate; the final 1/3 is folded
        # onto the small gate plane instead of the full NCHW block.
        y = acc * bn_ref[bn_off] + bn_ref[bn_off + 1]
        return jax.nn.sigmoid(y) * (1.0 / 3.0)      # (s1, s2) f32

    # Pooled (max, mean) planes — cast the small planes, not the whole block.
    mx_s = jnp.max(x, axis=0).astype(jnp.float32)                    # (H, W)
    mn_s = (jnp.sum(x, axis=0) * (1.0 / C)).astype(jnp.float32)
    mx_h = jnp.max(x, axis=1).astype(jnp.float32)                    # (C, W)
    mn_h = (jnp.sum(x, axis=1) * (1.0 / H)).astype(jnp.float32)
    mx_w = jnp.max(x, axis=2).astype(jnp.float32)                    # (C, H)
    mn_w = (jnp.sum(x, axis=2) * (1.0 / W)).astype(jnp.float32)

    g_s = gate(mx_s, mn_s, ts_ref, pad_s, 0)       # SpatialGate : pool C, plane (H, W)
    g_h = gate(mx_h, mn_h, th_ref, pad_h, 2)       # ChannelGateH: pool H, plane (C, W)
    g_w = gate(mx_w, mn_w, tw_ref, pad_w, 4)       # ChannelGateW: pool W, plane (C, H)

    # Broadcast: g_s const over C, g_h const over H, g_w const over W.
    gates = g_s[None, :, :] + g_h[:, None, :] + g_w[:, :, None]
    o_ref[0] = (x * gates).astype(o_ref.dtype)


# ------------------------------ host helpers --------------------------------

def _toeplitz_bank(k, s2):
    """k: (2, 7, 7) [channel, row-tap, col-tap] -> (7, 2, s2, s2) banded weights.

    bank[kh, c, j_in, j_out] = k[c, kh, j_in - j_out + PAD] inside the 7-wide
    band, 0 outside (which also implements the conv's column zero-padding).
    """
    j_in = jnp.arange(s2)[:, None]
    j_out = jnp.arange(s2)[None, :]
    kw = j_in - j_out + PAD                       # (s2, s2) column-tap index
    valid = (kw >= 0) & (kw < KSIZE)
    kw_c = jnp.clip(kw, 0, KSIZE - 1)
    bank = k[:, :, kw_c]                          # (2, 7, s2, s2)
    bank = jnp.where(valid[None, None, :, :], bank, 0.0)
    return jnp.transpose(bank, (1, 0, 2, 3)).astype(jnp.float32)


def _vmem_limit_bytes(C, H, W, dtype):
    """Generation-aware scoped-VMEM limit from a lane/sublane-padded estimate."""
    def tiled(r, c, itemsize):
        return (-(-r // 8) * 8) * (-(-c // 128) * 128) * itemsize

    isz = jnp.dtype(dtype).itemsize
    blk_io = C * tiled(H, W, isz)                 # one (1, C, H, W) block
    blk_f32 = C * tiled(H, W, 4)                  # gates / product temporaries
    scratch = 2 * (tiled(H + 2 * PAD, W, 4) + tiled(C + 2 * PAD, W, 4)
                   + tiled(C + 2 * PAD, H, 4))
    banks = 2 * KSIZE * 2 * (2 * tiled(W, W, 4) + tiled(H, H, 4))
    need = 2 * 2 * blk_io + 3 * blk_f32 + scratch + banks + (2 << 20)
    try:
        cap = int(getattr(pltpu.get_tpu_info(), "vmem_capacity_bytes"))
    except Exception:
        cap = 64 << 20                            # v7x per-core VMEM (most constrained)
    return int(min(max(need, 32 << 20), cap))


# ------------------------------ host wrapper --------------------------------

def triplet_attention(x, params):
    """x: (B, C, H, W) NCHW, matching the PyTorch module (eval-mode BN)."""
    B, C, H, W = x.shape

    bank_s = _toeplitz_bank(params["s"]["w"][0], W)                            # (7, 2, W, W)
    bank_h = _toeplitz_bank(params["h"]["w"][0], W)                            # (7, 2, W, W)
    bank_w = _toeplitz_bank(jnp.transpose(params["w"]["w"][0], (0, 2, 1)), H)  # (7, 2, H, H)
    bn_all = jnp.concatenate([params["s"]["bn"],
                              params["h"]["bn"],
                              params["w"]["bn"]]).astype(jnp.float32)

    return pl.pallas_call(
        _triplet_kernel,
        out_shape=jax.ShapeDtypeStruct(x.shape, x.dtype),
        grid=(B,),
        in_specs=[
            pl.BlockSpec(memory_space=pltpu.MemorySpace.SMEM),           # folded BN (6,)
            pl.BlockSpec((KSIZE, 2, W, W), lambda b: (0, 0, 0, 0)),      # bank_s
            pl.BlockSpec((KSIZE, 2, W, W), lambda b: (0, 0, 0, 0)),      # bank_h
            pl.BlockSpec((KSIZE, 2, H, H), lambda b: (0, 0, 0, 0)),      # bank_w
            pl.BlockSpec((1, C, H, W), lambda b: (b, 0, 0, 0)),          # x
        ],
        out_specs=pl.BlockSpec((1, C, H, W), lambda b: (b, 0, 0, 0)),
        scratch_shapes=[
            pltpu.VMEM((2, H + 2 * PAD, W), jnp.float32),   # SpatialGate  plane (H, W)
            pltpu.VMEM((2, C + 2 * PAD, W), jnp.float32),   # ChannelGateH plane (C, W)
            pltpu.VMEM((2, C + 2 * PAD, H), jnp.float32),   # ChannelGateW plane (C, H)
        ],
        compiler_params=pltpu.CompilerParams(
            dimension_semantics=("parallel",),              # >=2 steps when B>=2 -> megacore
            vmem_limit_bytes=_vmem_limit_bytes(C, H, W, x.dtype),
        ),
    )(bn_all, bank_s, bank_h, bank_w, x)


# --------------------------- parameter init & ref ---------------------------

def init_gate_params(key):
    w = jax.random.normal(key, (1, 2, KSIZE, KSIZE), jnp.float32) * 0.1
    gamma = jnp.float32(1.0)
    beta = jnp.float32(0.0)
    r_mean = jnp.float32(0.0)
    r_var = jnp.float32(1.0)
    bn_scale = gamma / jnp.sqrt(r_var + BN_EPS)
    bn_shift = beta - r_mean * bn_scale
    return {
        "w": w,
        "bn": jnp.array([bn_scale, bn_shift], dtype=jnp.float32),
        "bn_raw": (gamma, beta, r_mean, r_var),
    }


def init_params(key):
    kh, kw, ks = jax.random.split(key, 3)
    return {"h": init_gate_params(kh),
            "w": init_gate_params(kw),
            "s": init_gate_params(ks)}


def ref_spatial_gate(x_p, w, bn_raw):
    gamma, beta, r_mean, r_var = bn_raw
    mx = jnp.max(x_p, axis=1, keepdims=True)
    mn = jnp.mean(x_p, axis=1, keepdims=True)
    pooled = jnp.concatenate([mx, mn], axis=1)               # (B, 2, S1, S2)
    conv = jax.lax.conv_general_dilated(
        pooled, w, window_strides=(1, 1),
        padding=((PAD, PAD), (PAD, PAD)),
        dimension_numbers=("NCHW", "OIHW", "NCHW"))
    y = (conv - r_mean) / jnp.sqrt(r_var + BN_EPS) * gamma + beta
    return x_p * jax.nn.sigmoid(y)


def ref_triplet_attention(x, params):
    xp1 = jnp.transpose(x, (0, 2, 1, 3))
    o1 = ref_spatial_gate(xp1, params["h"]["w"], params["h"]["bn_raw"])
    o11 = jnp.transpose(o1, (0, 2, 1, 3))
    xp2 = jnp.transpose(x, (0, 3, 2, 1))
    o2 = ref_spatial_gate(xp2, params["w"]["w"], params["w"]["bn_raw"])
    o21 = jnp.transpose(o2, (0, 3, 2, 1))
    o3 = ref_spatial_gate(x, params["s"]["w"], params["s"]["bn_raw"])
    return (1.0 / 3.0) * (o3 + o11 + o21)


# ----------------------------------- main ------------------------------------

if __name__ == "__main__":
    key = jax.random.PRNGKey(0)
    kx, kp = jax.random.split(key)

    B, C, H, W = 2, 4, 16, 16
    x = jax.random.normal(kx, (B, C, H, W), jnp.float32)
    params = init_params(kp)

    out = jax.jit(lambda v: triplet_attention(v, params))(x)
    out = jax.block_until_ready(out)

    ref = ref_triplet_attention(x, params)
    assert out.shape == x.shape and out.dtype == x.dtype
    # 5e-3 tolerance covers MXU f32 precision-mode differences; real indexing /
    # orientation bugs would be O(0.1) and still fail.
    if not jnp.allclose(out, ref, atol=5e-3, rtol=5e-3):
        raise SystemExit("MISMATCH vs pure-JAX reference")

    print("KERNEL_OK")
</pallas_src>

<mosaic_0001>
module attributes {stable_mosaic.version = 11 : i64} {
  func.func @_triplet_kernel(%arg0: i32, %arg1: memref<6xf32, #tpu.memory_space<smem>>, %arg2: memref<7x2x16x16xf32, #tpu.memory_space<vmem>>, %arg3: memref<7x2x16x16xf32, #tpu.memory_space<vmem>>, %arg4: memref<7x2x16x16xf32, #tpu.memory_space<vmem>>, %arg5: memref<1x4x16x16xf32, #tpu.memory_space<vmem>>, %arg6: memref<1x4x16x16xf32, #tpu.memory_space<vmem>>, %arg7: memref<2x22x16xf32, #tpu.memory_space<vmem>>, %arg8: memref<2x10x16xf32, #tpu.memory_space<vmem>>, %arg9: memref<2x10x16xf32, #tpu.memory_space<vmem>>) attributes {dimension_semantics = [#tpu.dimension_semantics<parallel>], iteration_bounds = array<i64: 2>, scalar_prefetch = 0 : i64, scratch_operands = 3 : i64, tpu.core_type = #tpu.core_type<tc>, window_params = [{transform_indices = @transform_0, window_bounds = array<i64: 6>}, {pipeline_mode = #tpu.pipeline_mode<synchronous>, transform_indices = @transform_1, window_bounds = array<i64: 7, 2, 16, 16>}, {pipeline_mode = #tpu.pipeline_mode<synchronous>, transform_indices = @transform_2, window_bounds = array<i64: 7, 2, 16, 16>}, {pipeline_mode = #tpu.pipeline_mode<synchronous>, transform_indices = @transform_3, window_bounds = array<i64: 7, 2, 16, 16>}, {transform_indices = @transform_4, window_bounds = array<i64: 1, 4, 16, 16>}, {transform_indices = @transform_5, window_bounds = array<i64: 1, 4, 16, 16>}]} {
    %c0 = arith.constant 0 : index
    %c0_0 = arith.constant 0 : index
    %c0_1 = arith.constant 0 : index
    %c0_2 = arith.constant 0 : index
    %0 = vector.load %arg5[%c0, %c0_0, %c0_1, %c0_2] : memref<1x4x16x16xf32, #tpu.memory_space<vmem>>, vector<1x4x16x16xf32>
    %1 = vector.shape_cast %0 : vector<1x4x16x16xf32> to vector<4x16x16xf32>
    %cst = arith.constant dense<0xFF800000> : vector<16x16xf32>
    %2 = vector.multi_reduction <maximumf>, %1, %cst [0] : vector<4x16x16xf32> to vector<16x16xf32>
    %cst_3 = arith.constant dense<0.000000e+00> : vector<16x16xf32>
    %3 = vector.multi_reduction <add>, %1, %cst_3 [0] : vector<4x16x16xf32> to vector<16x16xf32>
    %cst_4 = arith.constant 2.500000e-01 : f32
    %4 = vector.broadcast %cst_4 : f32 to vector<16x16xf32>
    %5 = arith.mulf %3, %4 : vector<16x16xf32>
    %cst_5 = arith.constant dense<0xFF800000> : vector<4x16xf32>
    %6 = vector.multi_reduction <maximumf>, %1, %cst_5 [1] : vector<4x16x16xf32> to vector<4x16xf32>
    %cst_6 = arith.constant dense<0.000000e+00> : vector<4x16xf32>
    %7 = vector.multi_reduction <add>, %1, %cst_6 [1] : vector<4x16x16xf32> to vector<4x16xf32>
    %cst_7 = arith.constant 6.250000e-02 : f32
    %8 = vector.broadcast %cst_7 : f32 to vector<4x16xf32>
    %9 = arith.mulf %7, %8 : vector<4x16xf32>
    %cst_8 = arith.constant dense<0xFF800000> : vector<4x16xf32>
    %10 = vector.multi_reduction <maximumf>, %1, %cst_8 [2] : vector<4x16x16xf32> to vector<4x16xf32>
    %cst_9 = arith.constant dense<0.000000e+00> : vector<4x16xf32>
    %11 = vector.multi_reduction <add>, %1, %cst_9 [2] : vector<4x16x16xf32> to vector<4x16xf32>
    %cst_10 = arith.constant 6.250000e-02 : f32
    %12 = vector.broadcast %cst_10 : f32 to vector<4x16xf32>
    %13 = arith.mulf %11, %12 : vector<4x16xf32>
    %cst_11 = arith.constant 0.000000e+00 : f32
    %14 = vector.broadcast %cst_11 : f32 to vector<2x3x16xf32>
    %c0_12 = arith.constant 0 : index
    %c0_13 = arith.constant 0 : index
    %c0_14 = arith.constant 0 : index
    %15 = vector.load %arg7[%c0_12, %c0_13, %c0_14] : memref<2x22x16xf32, #tpu.memory_space<vmem>>, vector<2x3x16xf32>
    tpu.vector_store %arg7[%c0_12, %c0_13, %c0_14], %14 {strides = array<i32>} : memref<2x22x16xf32, #tpu.memory_space<vmem>>, vector<2x3x16xf32>,
    %cst_15 = arith.constant 0.000000e+00 : f32
    %16 = vector.broadcast %cst_15 : f32 to vector<2x3x16xf32>
    %c0_16 = arith.constant 0 : index
    %c19 = arith.constant 19 : index
    %c0_17 = arith.constant 0 : index
    %17 = vector.load %arg7[%c0_16, %c19, %c0_17] : memref<2x22x16xf32, #tpu.memory_space<vmem>>, vector<2x3x16xf32>
    tpu.vector_store %arg7[%c0_16, %c19, %c0_17], %16 {strides = array<i32>} : memref<2x22x16xf32, #tpu.memory_space<vmem>>, vector<2x3x16xf32>,
    %c0_18 = arith.constant 0 : index
    %c3 = arith.constant 3 : index
    %c0_19 = arith.constant 0 : index
    %18 = vector.load %arg7[%c0_18, %c3, %c0_19] : memref<2x22x16xf32, #tpu.memory_space<vmem>>, vector<1x16x16xf32>
    %19 = vector.shape_cast %18 : vector<1x16x16xf32> to vector<16x16xf32>
    %20 = vector.shape_cast %2 : vector<16x16xf32> to vector<1x16x16xf32>
    tpu.vector_store %arg7[%c0_18, %c3, %c0_19], %20 {strides = array<i32>} : memref<2x22x16xf32, #tpu.memory_space<vmem>>, vector<1x16x16xf32>,
    %c1 = arith.constant 1 : index
    %c3_20 = arith.constant 3 : index
    %c0_21 = arith.constant 0 : index
    %21 = vector.load %arg7[%c1, %c3_20, %c0_21] : memref<2x22x16xf32, #tpu.memory_space<vmem>>, vector<1x16x16xf32>
    %22 = vector.shape_cast %21 : vector<1x16x16xf32> to vector<16x16xf32>
    %23 = vector.shape_cast %5 : vector<16x16xf32> to vector<1x16x16xf32>
    tpu.vector_store %arg7[%c1, %c3_20, %c0_21], %23 {strides = array<i32>} : memref<2x22x16xf32, #tpu.memory_space<vmem>>, vector<1x16x16xf32>,
    %cst_22 = arith.constant 0.000000e+00 : f32
    %24 = vector.broadcast %cst_22 : f32 to vector<16x16xf32>
    %c0_23 = arith.constant 0 : index
    %c0_24 = arith.constant 0 : index
    %c0_25 = arith.constant 0 : index
    %25 = vector.load %arg7[%c0_23, %c0_24, %c0_25] : memref<2x22x16xf32, #tpu.memory_space<vmem>>, vector<2x16x16xf32>
    %26 = vector.extract_strided_slice %25 {offsets = [0, 0, 0], sizes = [1, 16, 16], strides = [1, 1, 1]} : vector<2x16x16xf32> to vector<1x16x16xf32>
    %27 = vector.shape_cast %26 : vector<1x16x16xf32> to vector<16x16xf32>
    %c0_26 = arith.constant 0 : index
    %c0_27 = arith.constant 0 : index
    %c0_28 = arith.constant 0 : index
    %c0_29 = arith.constant 0 : index
    %28 = vector.load %arg2[%c0_26, %c0_27, %c0_28, %c0_29] : memref<7x2x16x16xf32, #tpu.memory_space<vmem>>, vector<1x1x16x16xf32>
    %29 = vector.shape_cast %28 : vector<1x1x16x16xf32> to vector<16x16xf32>
    %cst_30 = arith.constant dense<0.000000e+00> : vector<16x16xf32>
    %30 = tpu.matmul %27, %29, %cst_30 {dimension_numbers = #tpu.dot_dimension_numbers<[1], [0], [0], [1], [0, 0, 1, 1], [], []>} : vector<16x16xf32>, vector<16x16xf32>, vector<16x16xf32> -> vector<16x16xf32>
    %31 = arith.addf %24, %30 : vector<16x16xf32>
    %32 = vector.extract_strided_slice %25 {offsets = [1, 0, 0], sizes = [1, 16, 16], strides = [1, 1, 1]} : vector<2x16x16xf32> to vector<1x16x16xf32>
    %33 = vector.shape_cast %32 : vector<1x16x16xf32> to vector<16x16xf32>
    %c0_31 = arith.constant 0 : index
    %c1_32 = arith.constant 1 : index
    %c0_33 = arith.constant 0 : index
    %c0_34 = arith.constant 0 : index
    %34 = vector.load %arg2[%c0_31, %c1_32, %c0_33, %c0_34] : memref<7x2x16x16xf32, #tpu.memory_space<vmem>>, vector<1x1x16x16xf32>
    %35 = vector.shape_cast %34 : vector<1x1x16x16xf32> to vector<16x16xf32>
    %cst_35 = arith.constant dense<0.000000e+00> : vector<16x16xf32>
    %36 = tpu.matmul %33, %35, %cst_35 {dimension_numbers = #tpu.dot_dimension_numbers<[1], [0], [0], [1], [0, 0, 1, 1], [], []>} : vector<16x16xf32>, vector<16x16xf32>, vector<16x16xf32> -> vector<16x16xf32>
    %37 = arith.addf %31, %36 : vector<16x16xf32>
    %c0_36 = arith.constant 0 : index
    %c1_37 = arith.constant 1 : index
    %c0_38 = arith.constant 0 : index
    %38 = vector.load %arg7[%c0_36, %c1_37, %c0_38] : memref<2x22x16xf32, #tpu.memory_space<vmem>>, vector<2x16x16xf32>
    %39 = vector.extract_strided_slice %38 {offsets = [0, 0, 0], sizes = [1, 16, 16], strides = [1, 1, 1]} : vector<2x16x16xf32> to vector<1x16x16xf32>
    %40 = vector.shape_cast %39 : vector<1x16x16xf32> to vector<16x16xf32>
    %c1_39 = arith.constant 1 : index
    %c0_40 = arith.constant 0 : index
    %c0_41 = arith.constant 0 : index
    %c0_42 = arith.constant 0 : index
    %41 = vector.load %arg2[%c1_39, %c0_40, %c0_41, %c0_42] : memref<7x2x16x16xf32, #tpu.memory_space<vmem>>, vector<1x1x16x16xf32>
    %42 = vector.shape_cast %41 : vector<1x1x16x16xf32> to vector<16x16xf32>
    %cst_43 = arith.constant dense<0.000000e+00> : vector<16x16xf32>
    %43 = tpu.matmul %40, %42, %cst_43 {dimension_numbers = #tpu.dot_dimension_numbers<[1], [0], [0], [1], [0, 0, 1, 1], [], []>} : vector<16x16xf32>, vector<16x16xf32>, vector<16x16xf32> -> vector<16x16xf32>
    %44 = arith.addf %37, %43 : vector<16x16xf32>
    %45 = vector.extract_strided_slice %38 {offsets = [1, 0, 0], sizes = [1, 16, 16], strides = [1, 1, 1]} : vector<2x16x16xf32> to vector<1x16x16xf32>
    %46 = vector.shape_cast %45 : vector<1x16x16xf32> to vector<16x16xf32>
    %c1_44 = arith.constant 1 : index
    %c1_45 = arith.constant 1 : index
    %c0_46 = arith.constant 0 : index
    %c0_47 = arith.constant 0 : index
    %47 = vector.load %arg2[%c1_44, %c1_45, %c0_46, %c0_47] : memref<7x2x16x16xf32, #tpu.memory_space<vmem>>, vector<1x1x16x16xf32>
    %48 = vector.shape_cast %47 : vector<1x1x16x16xf32> to vector<16x16xf32>
    %cst_48 = arith.constant dense<0.000000e+00> : vector<16x16xf32>
    %49 = tpu.matmul %46, %48, %cst_48 {dimension_numbers = #tpu.dot_dimension_numbers<[1], [0], [0], [1], [0, 0, 1, 1], [], []>} : vector<16x16xf32>, vector<16x16xf32>, vector<16x16xf32> -> vector<16x16xf32>
    %50 = arith.addf %44, %49 : vector<16x16xf32>
    %c0_49 = arith.constant 0 : index
    %c2 = arith.constant 2 : index
    %c0_50 = arith.constant 0 : index
    %51 = vector.load %arg7[%c0_49, %c2, %c0_50] : memref<2x22x16xf32, #tpu.memory_space<vmem>>, vector<2x16x16xf32>
    %52 = vector.extract_strided_slice %51 {offsets = [0, 0, 0], sizes = [1, 16, 16], strides = [1, 1, 1]} : vector<2x16x16xf32> to vector<1x16x16xf32>
    %53 = vector.shape_cast %52 : vector<1x16x16xf32> to vector<16x16xf32>
    %c2_51 = arith.constant 2 : index
    %c0_52 = arith.constant 0 : index
    %c0_53 = arith.constant 0 : index
    %c0_54 = arith.constant 0 : index
    %54 = vector.load %arg2[%c2_51, %c0_52, %c0_53, %c0_54] : memref<7x2x16x16xf32, #tpu.memory_space<vmem>>, vector<1x1x16x16xf32>
    %55 = vector.shape_cast %54 : vector<1x1x16x16xf32> to vector<16x16xf32>
    %cst_55 = arith.constant dense<0.000000e+00> : vector<16x16xf32>
    %56 = tpu.matmul %53, %55, %cst_55 {dimension_numbers = #tpu.dot_dimension_numbers<[1], [0], [0], [1], [0, 0, 1, 1], [], []>} : vector<16x16xf32>, vector<16x16xf32>, vector<16x16xf32> -> vector<16x16xf32>
    %57 = arith.addf %50, %56 : vector<16x16xf32>
    %58 = vector.extract_strided_slice %51 {offsets = [1, 0, 0], sizes = [1, 16, 16], strides = [1, 1, 1]} : vector<2x16x16xf32> to vector<1x16x16xf32>
    %59 = vector.shape_cast %58 : vector<1x16x16xf32> to vector<16x16xf32>
    %c2_56 = arith.constant 2 : index
    %c1_57 = arith.constant 1 : index
    %c0_58 = arith.constant 0 : index
    %c0_59 = arith.constant 0 : index
    %60 = vector.load %arg2[%c2_56, %c1_57, %c0_58, %c0_59] : memref<7x2x16x16xf32, #tpu.memory_space<vmem>>, vector<1x1x16x16xf32>
    %61 = vector.shape_cast %60 : vector<1x1x16x16xf32> to vector<16x16xf32>
    %cst_60 = arith.constant dense<0.000000e+00> : vector<16x16xf32>
    %62 = tpu.matmul %59, %61, %cst_60 {dimension_numbers = #tpu.dot_dimension_numbers<[1], [0], [0], [1], [0, 0, 1, 1], [], []>} : vector<16x16xf32>, vector<16x16xf32>, vector<16x16xf32> -> vector<16x16xf32>
    %63 = arith.addf %57, %62 : vector<16x16xf32>
    %c0_61 = arith.constant 0 : index
    %c3_62 = arith.constant 3 : index
    %c0_63 = arith.constant 0 : index
    %64 = vector.load %arg7[%c0_61, %c3_62, %c0_63] : memref<2x22x16xf32, #tpu.memory_space<vmem>>, vector<2x16x16xf32>
    %65 = vector.extract_strided_slice %64 {offsets = [0, 0, 0], sizes = [1, 16, 16], strides = [1, 1, 1]} : vector<2x16x16xf32> to vector<1x16x16xf32>
    %66 = vector.shape_cast %65 : vector<1x16x16xf32> to vector<16x16xf32>
    %c3_64 = arith.constant 3 : index
    %c0_65 = arith.constant 0 : index
    %c0_66 = arith.constant 0 : index
    %c0_67 = arith.constant 0 : index
    %67 = vector.load %arg2[%c3_64, %c0_65, %c0_66, %c0_67] : memref<7x2x16x16xf32, #tpu.memory_space<vmem>>, vector<1x1x16x16xf32>
    %68 = vector.shape_cast %67 : vector<1x1x16x16xf32> to vector<16x16xf32>
    %cst_68 = arith.constant dense<0.000000e+00> : vector<16x16xf32>
    %69 = tpu.matmul %66, %68, %cst_68 {dimension_numbers = #tpu.dot_dimension_numbers<[1], [0], [0], [1], [0, 0, 1, 1], [], []>} : vector<16x16xf32>, vector<16x16xf32>, vector<16x16xf32> -> vector<16x16xf32>
    %70 = arith.addf %63, %69 : vector<16x16xf32>
    %71 = vector.extract_strided_slice %64 {offsets = [1, 0, 0], sizes = [1, 16, 16], strides = [1, 1, 1]} : vector<2x16x16xf32> to vector<1x16x16xf32>
    %72 = vector.shape_cast %71 : vector<1x16x16xf32> to vector<16x16xf32>
    %c3_69 = arith.constant 3 : index
    %c1_70 = arith.constant 1 : index
    %c0_71 = arith.constant 0 : index
    %c0_72 = arith.constant 0 : index
    %73 = vector.load %arg2[%c3_69, %c1_70, %c0_71, %c0_72] : memref<7x2x16x16xf32, #tpu.memory_space<vmem>>, vector<1x1x16x16xf32>
    %74 = vector.shape_cast %73 : vector<1x1x16x16xf32> to vector<16x16xf32>
    %cst_73 = arith.constant dense<0.000000e+00> : vector<16x16xf32>
    %75 = tpu.matmul %72, %74, %cst_73 {dimension_numbers = #tpu.dot_dimension_numbers<[1], [0], [0], [1], [0, 0, 1, 1], [], []>} : vector<16x16xf32>, vector<16x16xf32>, vector<16x16xf32> -> vector<16x16xf32>
    %76 = arith.addf %70, %75 : vector<16x16xf32>
    %c0_74 = arith.constant 0 : index
    %c4 = arith.constant 4 : index
    %c0_75 = arith.constant 0 : index
    %77 = vector.load %arg7[%c0_74, %c4, %c0_75] : memref<2x22x16xf32, #tpu.memory_space<vmem>>, vector<2x16x16xf32>
    %78 = vector.extract_strided_slice %77 {offsets = [0, 0, 0], sizes = [1, 16, 16], strides = [1, 1, 1]} : vector<2x16x16xf32> to vector<1x16x16xf32>
    %79 = vector.shape_cast %78 : vector<1x16x16xf32> to vector<16x16xf32>
    %c4_76 = arith.constant 4 : index
    %c0_77 = arith.constant 0 : index
    %c0_78 = arith.constant 0 : index
    %c0_79 = arith.constant 0 : index
    %80 = vector.load %arg2[%c4_76, %c0_77, %c0_78, %c0_79] : memref<7x2x16x16xf32, #tpu.memory_space<vmem>>, vector<1x1x16x16xf32>
    %81 = vector.shape_cast %80 : vector<1x1x16x16xf32> to vector<16x16xf32>
    %cst_80 = arith.constant dense<0.000000e+00> : vector<16x16xf32>
    %82 = tpu.matmul %79, %81, %cst_80 {dimension_numbers = #tpu.dot_dimension_numbers<[1], [0], [0], [1], [0, 0, 1, 1], [], []>} : vector<16x16xf32>, vector<16x16xf32>, vector<16x16xf32> -> vector<16x16xf32>
    %83 = arith.addf %76, %82 : vector<16x16xf32>
    %84 = vector.extract_strided_slice %77 {offsets = [1, 0, 0], sizes = [1, 16, 16], strides = [1, 1, 1]} : vector<2x16x16xf32> to vector<1x16x16xf32>
    %85 = vector.shape_cast %84 : vector<1x16x16xf32> to vector<16x16xf32>
    %c4_81 = arith.constant 4 : index
    %c1_82 = arith.constant 1 : index
    %c0_83 = arith.constant 0 : index
    %c0_84 = arith.constant 0 : index
    %86 = vector.load %arg2[%c4_81, %c1_82, %c0_83, %c0_84] : memref<7x2x16x16xf32, #tpu.memory_space<vmem>>, vector<1x1x16x16xf32>
    %87 = vector.shape_cast %86 : vector<1x1x16x16xf32> to vector<16x16xf32>
    %cst_85 = arith.constant dense<0.000000e+00> : vector<16x16xf32>
    %88 = tpu.matmul %85, %87, %cst_85 {dimension_numbers = #tpu.dot_dimension_numbers<[1], [0], [0], [1], [0, 0, 1, 1], [], []>} : vector<16x16xf32>, vector<16x16xf32>, vector<16x16xf32> -> vector<16x16xf32>
    %89 = arith.addf %83, %88 : vector<16x16xf32>
    %c0_86 = arith.constant 0 : index
    %c5 = arith.constant 5 : index
    %c0_87 = arith.constant 0 : index
    %90 = vector.load %arg7[%c0_86, %c5, %c0_87] : memref<2x22x16xf32, #tpu.memory_space<vmem>>, vector<2x16x16xf32>
    %91 = vector.extract_strided_slice %90 {offsets = [0, 0, 0], sizes = [1, 16, 16], strides = [1, 1, 1]} : vector<2x16x16xf32> to vector<1x16x16xf32>
    %92 = vector.shape_cast %91 : vector<1x16x16xf32> to vector<16x16xf32>
    %c5_88 = arith.constant 5 : index
    %c0_89 = arith.constant 0 : index
    %c0_90 = arith.constant 0 : index
    %c0_91 = arith.constant 0 : index
    %93 = vector.load %arg2[%c5_88, %c0_89, %c0_90, %c0_91] : memref<7x2x16x16xf32, #tpu.memory_space<vmem>>, vector<1x1x16x16xf32>
    %94 = vector.shape_cast %93 : vector<1x1x16x16xf32> to vector<16x16xf32>
    %cst_92 = arith.constant dense<0.000000e+00> : vector<16x16xf32>
    %95 = tpu.matmul %92, %94, %cst_92 {dimension_numbers = #tpu.dot_dimension_numbers<[1], [0], [0], [1], [0, 0, 1, 1], [], []>} : vector<16x16xf32>, vector<16x16xf32>, vector<16x16xf32> -> vector<16x16xf32>
    %96 = arith.addf %89, %95 : vector<16x16xf32>
    %97 = vector.extract_strided_slice %90 {offsets = [1, 0, 0], sizes = [1, 16, 16], strides = [1, 1, 1]} : vector<2x16x16xf32> to vector<1x16x16xf32>
    %98 = vector.shape_cast %97 : vector<1x16x16xf32> to vector<16x16xf32>
    %c5_93 = arith.constant 5 : index
    %c1_94 = arith.constant 1 : index
    %c0_95 = arith.constant 0 : index
    %c0_96 = arith.constant 0 : index
    %99 = vector.load %arg2[%c5_93, %c1_94, %c0_95, %c0_96] : memref<7x2x16x16xf32, #tpu.memory_space<vmem>>, vector<1x1x16x16xf32>
    %100 = vector.shape_cast %99 : vector<1x1x16x16xf32> to vector<16x16xf32>
    %cst_97 = arith.constant dense<0.000000e+00> : vector<16x16xf32>
    %101 = tpu.matmul %98, %100, %cst_97 {dimension_numbers = #tpu.dot_dimension_numbers<[1], [0], [0], [1], [0, 0, 1, 1], [], []>} : vector<16x16xf32>, vector<16x16xf32>, vector<16x16xf32> -> vector<16x16xf32>
    %102 = arith.addf %96, %101 : vector<16x16xf32>
    %c0_98 = arith.constant 0 : index
    %c6 = arith.constant 6 : index
    %c0_99 = arith.constant 0 : index
    %103 = vector.load %arg7[%c0_98, %c6, %c0_99] : memref<2x22x16xf32, #tpu.memory_space<vmem>>, vector<2x16x16xf32>
    %104 = vector.extract_strided_slice %103 {offsets = [0, 0, 0], sizes = [1, 16, 16], strides = [1, 1, 1]} : vector<2x16x16xf32> to vector<1x16x16xf32>
    %105 = vector.shape_cast %104 : vector<1x16x16xf32> to vector<16x16xf32>
    %c6_100 = arith.constant 6 : index
    %c0_101 = arith.constant 0 : index
    %c0_102 = arith.constant 0 : index
    %c0_103 = arith.constant 0 : index
    %106 = vector.load %arg2[%c6_100, %c0_101, %c0_102, %c0_103] : memref<7x2x16x16xf32, #tpu.memory_space<vmem>>, vector<1x1x16x16xf32>
    %107 = vector.shape_cast %106 : vector<1x1x16x16xf32> to vector<16x16xf32>
    %cst_104 = arith.constant dense<0.000000e+00> : vector<16x16xf32>
    %108 = tpu.matmul %105, %107, %cst_104 {dimension_numbers = #tpu.dot_dimension_numbers<[1], [0], [0], [1], [0, 0, 1, 1], [], []>} : vector<16x16xf32>, vector<16x16xf32>, vector<16x16xf32> -> vector<16x16xf32>
    %109 = arith.addf %102, %108 : vector<16x16xf32>
    %110 = vector.extract_strided_slice %103 {offsets = [1, 0, 0], sizes = [1, 16, 16], strides = [1, 1, 1]} : vector<2x16x16xf32> to vector<1x16x16xf32>
    %111 = vector.shape_cast %110 : vector<1x16x16xf32> to vector<16x16xf32>
    %c6_105 = arith.constant 6 : index
    %c1_106 = arith.constant 1 : index
    %c0_107 = arith.constant 0 : index
    %c0_108 = arith.constant 0 : index
    %112 = vector.load %arg2[%c6_105, %c1_106, %c0_107, %c0_108] : memref<7x2x16x16xf32, #tpu.memory_space<vmem>>, vector<1x1x16x16xf32>
    %113 = vector.shape_cast %112 : vector<1x1x16x16xf32> to vector<16x16xf32>
    %cst_109 = arith.constant dense<0.000000e+00> : vector<16x16xf32>
    %114 = tpu.matmul %111, %113, %cst_109 {dimension_numbers = #tpu.dot_dimension_numbers<[1], [0], [0], [1], [0, 0, 1, 1], [], []>} : vector<16x16xf32>, vector<16x16xf32>, vector<16x16xf32> -> vector<16x16xf32>
    %115 = arith.addf %109, %114 : vector<16x16xf32>
    %c0_110 = arith.constant 0 : index
    %116 = memref.load %arg1[%c0_110] : memref<6xf32, #tpu.memory_space<smem>>
    %117 = vector.broadcast %116 : f32 to vector<16x16xf32>
    %118 = arith.mulf %115, %117 : vector<16x16xf32>
    %c1_111 = arith.constant 1 : index
    %119 = memref.load %arg1[%c1_111] : memref<6xf32, #tpu.memory_space<smem>>
    %120 = vector.broadcast %119 : f32 to vector<16x16xf32>
    %121 = arith.addf %118, %120 : vector<16x16xf32>
    %122 = arith.negf %121 : vector<16x16xf32>
    %123 = math.exp %122 : vector<16x16xf32>
    %cst_112 = arith.constant 1.000000e+00 : f32
    %124 = vector.broadcast %cst_112 : f32 to vector<16x16xf32>
    %125 = arith.addf %124, %123 : vector<16x16xf32>
    %126 = arith.divf %124, %125 : vector<16x16xf32>
    %cst_113 = arith.constant 0.333333343 : f32
    %127 = vector.broadcast %cst_113 : f32 to vector<16x16xf32>
    %128 = arith.mulf %126, %127 : vector<16x16xf32>
    %cst_114 = arith.constant 0.000000e+00 : f32
    %129 = vector.broadcast %cst_114 : f32 to vector<2x3x16xf32>
    %c0_115 = arith.constant 0 : index
    %c0_116 = arith.constant 0 : index
    %c0_117 = arith.constant 0 : index
    %130 = vector.load %arg8[%c0_115, %c0_116, %c0_117] : memref<2x10x16xf32, #tpu.memory_space<vmem>>, vector<2x3x16xf32>
    tpu.vector_store %arg8[%c0_115, %c0_116, %c0_117], %129 {strides = array<i32>} : memref<2x10x16xf32, #tpu.memory_space<vmem>>, vector<2x3x16xf32>,
    %cst_118 = arith.constant 0.000000e+00 : f32
    %131 = vector.broadcast %cst_118 : f32 to vector<2x3x16xf32>
    %c0_119 = arith.constant 0 : index
    %c7 = arith.constant 7 : index
    %c0_120 = arith.constant 0 : index
    %132 = vector.load %arg8[%c0_119, %c7, %c0_120] : memref<2x10x16xf32, #tpu.memory_space<vmem>>, vector<2x3x16xf32>
    tpu.vector_store %arg8[%c0_119, %c7, %c0_120], %131 {strides = array<i32>} : memref<2x10x16xf32, #tpu.memory_space<vmem>>, vector<2x3x16xf32>,
    %c0_121 = arith.constant 0 : index
    %c3_122 = arith.constant 3 : index
    %c0_123 = arith.constant 0 : index
    %133 = vector.load %arg8[%c0_121, %c3_122, %c0_123] : memref<2x10x16xf32, #tpu.memory_space<vmem>>, vector<1x4x16xf32>
    %134 = vector.shape_cast %133 : vector<1x4x16xf32> to vector<4x16xf32>
    %135 = vector.shape_cast %6 : vector<4x16xf32> to vector<1x4x16xf32>
    tpu.vector_store %arg8[%c0_121, %c3_122, %c0_123], %135 {strides = array<i32>} : memref<2x10x16xf32, #tpu.memory_space<vmem>>, vector<1x4x16xf32>,
    %c1_124 = arith.constant 1 : index
    %c3_125 = arith.constant 3 : index
    %c0_126 = arith.constant 0 : index
    %136 = vector.load %arg8[%c1_124, %c3_125, %c0_126] : memref<2x10x16xf32, #tpu.memory_space<vmem>>, vector<1x4x16xf32>
    %137 = vector.shape_cast %136 : vector<1x4x16xf32> to vector<4x16xf32>
    %138 = vector.shape_cast %9 : vector<4x16xf32> to vector<1x4x16xf32>
    tpu.vector_store %arg8[%c1_124, %c3_125, %c0_126], %138 {strides = array<i32>} : memref<2x10x16xf32, #tpu.memory_space<vmem>>, vector<1x4x16xf32>,
    %cst_127 = arith.constant 0.000000e+00 : f32
    %139 = vector.broadcast %cst_127 : f32 to vector<4x16xf32>
    %c0_128 = arith.constant 0 : index
    %c0_129 = arith.constant 0 : index
    %c0_130 = arith.constant 0 : index
    %140 = vector.load %arg8[%c0_128, %c0_129, %c0_130] : memref<2x10x16xf32, #tpu.memory_space<vmem>>, vector<2x4x16xf32>
    %141 = vector.extract_strided_slice %140 {offsets = [0, 0, 0], sizes = [1, 4, 16], strides = [1, 1, 1]} : vector<2x4x16xf32> to vector<1x4x16xf32>
    %142 = vector.shape_cast %141 : vector<1x4x16xf32> to vector<4x16xf32>
    %c0_131 = arith.constant 0 : index
    %c0_132 = arith.constant 0 : index
    %c0_133 = arith.constant 0 : index
    %c0_134 = arith.constant 0 : index
    %143 = vector.load %arg3[%c0_131, %c0_132, %c0_133, %c0_134] : memref<7x2x16x16xf32, #tpu.memory_space<vmem>>, vector<1x1x16x16xf32>
    %144 = vector.shape_cast %143 : vector<1x1x16x16xf32> to vector<16x16xf32>
    %cst_135 = arith.constant dense<0.000000e+00> : vector<4x16xf32>
    %145 = tpu.matmul %142, %144, %cst_135 {dimension_numbers = #tpu.dot_dimension_numbers<[1], [0], [0], [1], [0, 0, 1, 1], [], []>} : vector<4x16xf32>, vector<16x16xf32>, vector<4x16xf32> -> vector<4x16xf32>
    %146 = arith.addf %139, %145 : vector<4x16xf32>
    %147 = vector.extract_strided_slice %140 {offsets = [1, 0, 0], sizes = [1, 4, 16], strides = [1, 1, 1]} : vector<2x4x16xf32> to vector<1x4x16xf32>
    %148 = vector.shape_cast %147 : vector<1x4x16xf32> to vector<4x16xf32>
    %c0_136 = arith.constant 0 : index
    %c1_137 = arith.constant 1 : index
    %c0_138 = arith.constant 0 : index
    %c0_139 = arith.constant 0 : index
    %149 = vector.load %arg3[%c0_136, %c1_137, %c0_138, %c0_139] : memref<7x2x16x16xf32, #tpu.memory_space<vmem>>, vector<1x1x16x16xf32>
    %150 = vector.shape_cast %149 : vector<1x1x16x16xf32> to vector<16x16xf32>
    %cst_140 = arith.constant dense<0.000000e+00> : vector<4x16xf32>
    %151 = tpu.matmul %148, %150, %cst_140 {dimension_numbers = #tpu.dot_dimension_numbers<[1], [0], [0], [1], [0, 0, 1, 1], [], []>} : vector<4x16xf32>, vector<16x16xf32>, vector<4x16xf32> -> vector<4x16xf32>
    %152 = arith.addf %146, %151 : vector<4x16xf32>
    %c0_141 = arith.constant 0 : index
    %c1_142 = arith.constant 1 : index
    %c0_143 = arith.constant 0 : index
    %153 = vector.load %arg8[%c0_141, %c1_142, %c0_143] : memref<2x10x16xf32, #tpu.memory_space<vmem>>, vector<2x4x16xf32>
    %154 = vector.extract_strided_slice %153 {offsets = [0, 0, 0], sizes = [1, 4, 16], strides = [1, 1, 1]} : vector<2x4x16xf32> to vector<1x4x16xf32>
    %155 = vector.shape_cast %154 : vector<1x4x16xf32> to vector<4x16xf32>
    %c1_144 = arith.constant 1 : index
    %c0_145 = arith.constant 0 : index
    %c0_146 = arith.constant 0 : index
    %c0_147 = arith.constant 0 : index
    %156 = vector.load %arg3[%c1_144, %c0_145, %c0_146, %c0_147] : memref<7x2x16x16xf32, #tpu.memory_space<vmem>>, vector<1x1x16x16xf32>
    %157 = vector.shape_cast %156 : vector<1x1x16x16xf32> to vector<16x16xf32>
    %cst_148 = arith.constant dense<0.000000e+00> : vector<4x16xf32>
    %158 = tpu.matmul %155, %157, %cst_148 {dimension_numbers = #tpu.dot_dimension_numbers<[1], [0], [0], [1], [0, 0, 1, 1], [], []>} : vector<4x16xf32>, vector<16x16xf32>, vector<4x16xf32> -> vector<4x16xf32>
    %159 = arith.addf %152, %158 : vector<4x16xf32>
    %160 = vector.extract_strided_slice %153 {offsets = [1, 0, 0], sizes = [1, 4, 16], strides = [1, 1, 1]} : vector<2x4x16xf32> to vector<1x4x16xf32>
    %161 = vector.shape_cast %160 : vector<1x4x16xf32> to vector<4x16xf32>
    %c1_149 = arith.constant 1 : index
    %c1_150 = arith.constant 1 : index
    %c0_151 = arith.constant 0 : index
    %c0_152 = arith.constant 0 : index
    %162 = vector.load %arg3[%c1_149, %c1_150, %c0_151, %c0_152] : memref<7x2x16x16xf32, #tpu.memory_space<vmem>>, vector<1x1x16x16xf32>
    %163 = vector.shape_cast %162 : vector<1x1x16x16xf32> to vector<16x16xf32>
    %cst_153 = arith.constant dense<0.000000e+00> : vector<4x16xf32>
    %164 = tpu.matmul %161, %163, %cst_153 {dimension_numbers = #tpu.dot_dimension_numbers<[1], [0], [0], [1], [0, 0, 1, 1], [], []>} : vector<4x16xf32>, vector<16x16xf32>, vector<4x16xf32> -> vector<4x16xf32>
    %165 = arith.addf %159, %164 : vector<4x16xf32>
    %c0_154 = arith.constant 0 : index
    %c2_155 = arith.constant 2 : index
    %c0_156 = arith.constant 0 : index
    %166 = vector.load %arg8[%c0_154, %c2_155, %c0_156] : memref<2x10x16xf32, #tpu.memory_space<vmem>>, vector<2x4x16xf32>
    %167 = vector.extract_strided_slice %166 {offsets = [0, 0, 0], sizes = [1, 4, 16], strides = [1, 1, 1]} : vector<2x4x16xf32> to vector<1x4x16xf32>
    %168 = vector.shape_cast %167 : vector<1x4x16xf32> to vector<4x16xf32>
    %c2_157 = arith.constant 2 : index
    %c0_158 = arith.constant 0 : index
    %c0_159 = arith.constant 0 : index
    %c0_160 = arith.constant 0 : index
    %169 = vector.load %arg3[%c2_157, %c0_158, %c0_159, %c0_160] : memref<7x2x16x16xf32, #tpu.memory_space<vmem>>, vector<1x1x16x16xf32>
    %170 = vector.shape_cast %169 : vector<1x1x16x16xf32> to vector<16x16xf32>
    %cst_161 = arith.constant dense<0.000000e+00> : vector<4x16xf32>
    %171 = tpu.matmul %168, %170, %cst_161 {dimension_numbers = #tpu.dot_dimension_numbers<[1], [0], [0], [1], [0, 0, 1, 1], [], []>} : vector<4x16xf32>, vector<16x16xf32>, vector<4x16xf32> -> vector<4x16xf32>
    %172 = arith.addf %165, %171 : vector<4x16xf32>
    %173 = vector.extract_strided_slice %166 {offsets = [1, 0, 0], sizes = [1, 4, 16], strides = [1, 1, 1]} : vector<2x4x16xf32> to vector<1x4x16xf32>
    %174 = vector.shape_cast %173 : vector<1x4x16xf32> to vector<4x16xf32>
    %c2_162 = arith.constant 2 : index
    %c1_163 = arith.constant 1 : index
    %c0_164 = arith.constant 0 : index
    %c0_165 = arith.constant 0 : index
    %175 = vector.load %arg3[%c2_162, %c1_163, %c0_164, %c0_165] : memref<7x2x16x16xf32, #tpu.memory_space<vmem>>, vector<1x1x16x16xf32>
    %176 = vector.shape_cast %175 : vector<1x1x16x16xf32> to vector<16x16xf32>
    %cst_166 = arith.constant dense<0.000000e+00> : vector<4x16xf32>
    %177 = tpu.matmul %174, %176, %cst_166 {dimension_numbers = #tpu.dot_dimension_numbers<[1], [0], [0], [1], [0, 0, 1, 1], [], []>} : vector<4x16xf32>, vector<16x16xf32>, vector<4x16xf32> -> vector<4x16xf32>
    %178 = arith.addf %172, %177 : vector<4x16xf32>
    %c0_167 = arith.constant 0 : index
    %c3_168 = arith.constant 3 : index
    %c0_169 = arith.constant 0 : index
    %179 = vector.load %arg8[%c0_167, %c3_168, %c0_169] : memref<2x10x16xf32, #tpu.memory_space<vmem>>, vector<2x4x16xf32>
    %180 = vector.extract_strided_slice %179 {offsets = [0, 0, 0], sizes = [1, 4, 16], strides = [1, 1, 1]} : vector<2x4x16xf32> to vector<1x4x16xf32>
    %181 = vector.shape_cast %180 : vector<1x4x16xf32> to vector<4x16xf32>
    %c3_170 = arith.constant 3 : index
    %c0_171 = arith.constant 0 : index
    %c0_172 = arith.constant 0 : index
    %c0_173 = arith.constant 0 : index
    %182 = vector.load %arg3[%c3_170, %c0_171, %c0_172, %c0_173] : memref<7x2x16x16xf32, #tpu.memory_space<vmem>>, vector<1x1x16x16xf32>
    %183 = vector.shape_cast %182 : vector<1x1x16x16xf32> to vector<16x16xf32>
    %cst_174 = arith.constant dense<0.000000e+00> : vector<4x16xf32>
    %184 = tpu.matmul %181, %183, %cst_174 {dimension_numbers = #tpu.dot_dimension_numbers<[1], [0], [0], [1], [0, 0, 1, 1], [], []>} : vector<4x16xf32>, vector<16x16xf32>, vector<4x16xf32> -> vector<4x16xf32>
    %185 = arith.addf %178, %184 : vector<4x16xf32>
    %186 = vector.extract_strided_slice %179 {offsets = [1, 0, 0], sizes = [1, 4, 16], strides = [1, 1, 1]} : vector<2x4x16xf32> to vector<1x4x16xf32>
    %187 = vector.shape_cast %186 : vector<1x4x16xf32> to vector<4x16xf32>
    %c3_175 = arith.constant 3 : index
    %c1_176 = arith.constant 1 : index
    %c0_177 = arith.constant 0 : index
    %c0_178 = arith.constant 0 : index
    %188 = vector.load %arg3[%c3_175, %c1_176, %c0_177, %c0_178] : memref<7x2x16x16xf32, #tpu.memory_space<vmem>>, vector<1x1x16x16xf32>
    %189 = vector.shape_cast %188 : vector<1x1x16x16xf32> to vector<16x16xf32>
    %cst_179 = arith.constant dense<0.000000e+00> : vector<4x16xf32>
    %190 = tpu.matmul %187, %189, %cst_179 {dimension_numbers = #tpu.dot_dimension_numbers<[1], [0], [0], [1], [0, 0, 1, 1], [], []>} : vector<4x16xf32>, vector<16x16xf32>, vector<4x16xf32> -> vector<4x16xf32>
    %191 = arith.addf %185, %190 : vector<4x16xf32>
    %c0_180 = arith.constant 0 : index
    %c4_181 = arith.constant 4 : index
    %c0_182 = arith.constant 0 : index
    %192 = vector.load %arg8[%c0_180, %c4_181, %c0_182] : memref<2x10x16xf32, #tpu.memory_space<vmem>>, vector<2x4x16xf32>
    %193 = vector.extract_strided_slice %192 {offsets = [0, 0, 0], sizes = [1, 4, 16], strides = [1, 1, 1]} : vector<2x4x16xf32> to vector<1x4x16xf32>
    %194 = vector.shape_cast %193 : vector<1x4x16xf32> to vector<4x16xf32>
    %c4_183 = arith.constant 4 : index
    %c0_184 = arith.constant 0 : index
    %c0_185 = arith.constant 0 : index
    %c0_186 = arith.constant 0 : index
    %195 = vector.load %arg3[%c4_183, %c0_184, %c0_185, %c0_186] : memref<7x2x16x16xf32, #tpu.memory_space<vmem>>, vector<1x1x16x16xf32>
    %196 = vector.shape_cast %195 : vector<1x1x16x16xf32> to vector<16x16xf32>
    %cst_187 = arith.constant dense<0.000000e+00> : vector<4x16xf32>
    %197 = tpu.matmul %194, %196, %cst_187 {dimension_numbers = #tpu.dot_dimension_numbers<[1], [0], [0], [1], [0, 0, 1, 1], [], []>} : vector<4x16xf32>, vector<16x16xf32>, vector<4x16xf32> -> vector<4x16xf32>
    %198 = arith.addf %191, %197 : vector<4x16xf32>
    %199 = vector.extract_strided_slice %192 {offsets = [1, 0, 0], sizes = [1, 4, 16], strides = [1, 1, 1]} : vector<2x4x16xf32> to vector<1x4x16xf32>
    %200 = vector.shape_cast %199 : vector<1x4x16xf32> to vector<4x16xf32>
    %c4_188 = arith.constant 4 : index
    %c1_189 = arith.constant 1 : index
    %c0_190 = arith.constant 0 : index
    %c0_191 = arith.constant 0 : index
    %201 = vector.load %arg3[%c4_188, %c1_189, %c0_190, %c0_191] : memref<7x2x16x16xf32, #tpu.memory_space<vmem>>, vector<1x1x16x16xf32>
    %202 = vector.shape_cast %201 : vector<1x1x16x16xf32> to vector<16x16xf32>
    %cst_192 = arith.constant dense<0.000000e+00> : vector<4x16xf32>
    %203 = tpu.matmul %200, %202, %cst_192 {dimension_numbers = #tpu.dot_dimension_numbers<[1], [0], [0], [1], [0, 0, 1, 1], [], []>} : vector<4x16xf32>, vector<16x16xf32>, vector<4x16xf32> -> vector<4x16xf32>
    %204 = arith.addf %198, %203 : vector<4x16xf32>
    %c0_193 = arith.constant 0 : index
    %c5_194 = arith.constant 5 : index
    %c0_195 = arith.constant 0 : index
    %205 = vector.load %arg8[%c0_193, %c5_194, %c0_195] : memref<2x10x16xf32, #tpu.memory_space<vmem>>, vector<2x4x16xf32>
    %206 = vector.extract_strided_slice %205 {offsets = [0, 0, 0], sizes = [1, 4, 16], strides = [1, 1, 1]} : vector<2x4x16xf32> to vector<1x4x16xf32>
    %207 = vector.shape_cast %206 : vector<1x4x16xf32> to vector<4x16xf32>
    %c5_196 = arith.constant 5 : index
    %c0_197 = arith.constant 0 : index
    %c0_198 = arith.constant 0 : index
    %c0_199 = arith.constant 0 : index
    %208 = vector.load %arg3[%c5_196, %c0_197, %c0_198, %c0_199] : memref<7x2x16x16xf32, #tpu.memory_space<vmem>>, vector<1x1x16x16xf32>
    %209 = vector.shape_cast %208 : vector<1x1x16x16xf32> to vector<16x16xf32>
    %cst_200 = arith.constant dense<0.000000e+00> : vector<4x16xf32>
    %210 = tpu.matmul %207, %209, %cst_200 {dimension_numbers = #tpu.dot_dimension_numbers<[1], [0], [0], [1], [0, 0, 1, 1], [], []>} : vector<4x16xf32>, vector<16x16xf32>, vector<4x16xf32> -> vector<4x16xf32>
    %211 = arith.addf %204, %210 : vector<4x16xf32>
    %212 = vector.extract_strided_slice %205 {offsets = [1, 0, 0], sizes = [1, 4, 16], strides = [1, 1, 1]} : vector<2x4x16xf32> to vector<1x4x16xf32>
    %213 = vector.shape_cast %212 : vector<1x4x16xf32> to vector<4x16xf32>
    %c5_201 = arith.constant 5 : index
    %c1_202 = arith.constant 1 : index
    %c0_203 = arith.constant 0 : index
    %c0_204 = arith.constant 0 : index
    %214 = vector.load %arg3[%c5_201, %c1_202, %c0_203, %c0_204] : memref<7x2x16x16xf32, #tpu.memory_space<vmem>>, vector<1x1x16x16xf32>
    %215 = vector.shape_cast %214 : vector<1x1x16x16xf32> to vector<16x16xf32>
    %cst_205 = arith.constant dense<0.000000e+00> : vector<4x16xf32>
    %216 = tpu.matmul %213, %215, %cst_205 {dimension_numbers = #tpu.dot_dimension_numbers<[1], [0], [0], [1], [0, 0, 1, 1], [], []>} : vector<4x16xf32>, vector<16x16xf32>, vector<4x16xf32> -> vector<4x16xf32>
    %217 = arith.addf %211, %216 : vector<4x16xf32>
    %c0_206 = arith.constant 0 : index
    %c6_207 = arith.constant 6 : index
    %c0_208 = arith.constant 0 : index
    %218 = vector.load %arg8[%c0_206, %c6_207, %c0_208] : memref<2x10x16xf32, #tpu.memory_space<vmem>>, vector<2x4x16xf32>
    %219 = vector.extract_strided_slice %218 {offsets = [0, 0, 0], sizes = [1, 4, 16], strides = [1, 1, 1]} : vector<2x4x16xf32> to vector<1x4x16xf32>
    %220 = vector.shape_cast %219 : vector<1x4x16xf32> to vector<4x16xf32>
    %c6_209 = arith.constant 6 : index
    %c0_210 = arith.constant 0 : index
    %c0_211 = arith.constant 0 : index
    %c0_212 = arith.constant 0 : index
    %221 = vector.load %arg3[%c6_209, %c0_210, %c0_211, %c0_212] : memref<7x2x16x16xf32, #tpu.memory_space<vmem>>, vector<1x1x16x16xf32>
    %222 = vector.shape_cast %221 : vector<1x1x16x16xf32> to vector<16x16xf32>
    %cst_213 = arith.constant dense<0.000000e+00> : vector<4x16xf32>
    %223 = tpu.matmul %220, %222, %cst_213 {dimension_numbers = #tpu.dot_dimension_numbers<[1], [0], [0], [1], [0, 0, 1, 1], [], []>} : vector<4x16xf32>, vector<16x16xf32>, vector<4x16xf32> -> vector<4x16xf32>
    %224 = arith.addf %217, %223 : vector<4x16xf32>
    %225 = vector.extract_strided_slice %218 {offsets = [1, 0, 0], sizes = [1, 4, 16], strides = [1, 1, 1]} : vector<2x4x16xf32> to vector<1x4x16xf32>
    %226 = vector.shape_cast %225 : vector<1x4x16xf32> to vector<4x16xf32>
    %c6_214 = arith.constant 6 : index
    %c1_215 = arith.constant 1 : index
    %c0_216 = arith.constant 0 : index
    %c0_217 = arith.constant 0 : index
    %227 = vector.load %arg3[%c6_214, %c1_215, %c0_216, %c0_217] : memref<7x2x16x16xf32, #tpu.memory_space<vmem>>, vector<1x1x16x16xf32>
    %228 = vector.shape_cast %227 : vector<1x1x16x16xf32> to vector<16x16xf32>
    %cst_218 = arith.constant dense<0.000000e+00> : vector<4x16xf32>
    %229 = tpu.matmul %226, %228, %cst_218 {dimension_numbers = #tpu.dot_dimension_numbers<[1], [0], [0], [1], [0, 0, 1, 1], [], []>} : vector<4x16xf32>, vector<16x16xf32>, vector<4x16xf32> -> vector<4x16xf32>
    %230 = arith.addf %224, %229 : vector<4x16xf32>
    %c2_219 = arith.constant 2 : index
    %231 = memref.load %arg1[%c2_219] : memref<6xf32, #tpu.memory_space<smem>>
    %232 = vector.broadcast %231 : f32 to vector<4x16xf32>
    %233 = arith.mulf %230, %232 : vector<4x16xf32>
    %c3_220 = arith.constant 3 : index
    %234 = memref.load %arg1[%c3_220] : memref<6xf32, #tpu.memory_space<smem>>
    %235 = vector.broadcast %234 : f32 to vector<4x16xf32>
    %236 = arith.addf %233, %235 : vector<4x16xf32>
    %237 = arith.negf %236 : vector<4x16xf32>
    %238 = math.exp %237 : vector<4x16xf32>
    %cst_221 = arith.constant 1.000000e+00 : f32
    %239 = vector.broadcast %cst_221 : f32 to vector<4x16xf32>
    %240 = arith.addf %239, %238 : vector<4x16xf32>
    %241 = arith.divf %239, %240 : vector<4x16xf32>
    %cst_222 = arith.constant 0.333333343 : f32
    %242 = vector.broadcast %cst_222 : f32 to vector<4x16xf32>
    %243 = arith.mulf %241, %242 : vector<4x16xf32>
    %cst_223 = arith.constant 0.000000e+00 : f32
    %244 = vector.broadcast %cst_223 : f32 to vector<2x3x16xf32>
    %c0_224 = arith.constant 0 : index
    %c0_225 = arith.constant 0 : index
    %c0_226 = arith.constant 0 : index
    %245 = vector.load %arg9[%c0_224, %c0_225, %c0_226] : memref<2x10x16xf32, #tpu.memory_space<vmem>>, vector<2x3x16xf32>
    tpu.vector_store %arg9[%c0_224, %c0_225, %c0_226], %244 {strides = array<i32>} : memref<2x10x16xf32, #tpu.memory_space<vmem>>, vector<2x3x16xf32>,
    %cst_227 = arith.constant 0.000000e+00 : f32
    %246 = vector.broadcast %cst_227 : f32 to vector<2x3x16xf32>
    %c0_228 = arith.constant 0 : index
    %c7_229 = arith.constant 7 : index
    %c0_230 = arith.constant 0 : index
    %247 = vector.load %arg9[%c0_228, %c7_229, %c0_230] : memref<2x10x16xf32, #tpu.memory_space<vmem>>, vector<2x3x16xf32>
    tpu.vector_store %arg9[%c0_228, %c7_229, %c0_230], %246 {strides = array<i32>} : memref<2x10x16xf32, #tpu.memory_space<vmem>>, vector<2x3x16xf32>,
    %c0_231 = arith.constant 0 : index
    %c3_232 = arith.constant 3 : index
    %c0_233 = arith.constant 0 : index
    %248 = vector.load %arg9[%c0_231, %c3_232, %c0_233] : memref<2x10x16xf32, #tpu.memory_space<vmem>>, vector<1x4x16xf32>
    %249 = vector.shape_cast %248 : vector<1x4x16xf32> to vector<4x16xf32>
    %250 = vector.shape_cast %10 : vector<4x16xf32> to vector<1x4x16xf32>
    tpu.vector_store %arg9[%c0_231, %c3_232, %c0_233], %250 {strides = array<i32>} : memref<2x10x16xf32, #tpu.memory_space<vmem>>, vector<1x4x16xf32>,
    %c1_234 = arith.constant 1 : index
    %c3_235 = arith.constant 3 : index
    %c0_236 = arith.constant 0 : index
    %251 = vector.load %arg9[%c1_234, %c3_235, %c0_236] : memref<2x10x16xf32, #tpu.memory_space<vmem>>, vector<1x4x16xf32>
    %252 = vector.shape_cast %251 : vector<1x4x16xf32> to vector<4x16xf32>
    %253 = vector.shape_cast %13 : vector<4x16xf32> to vector<1x4x16xf32>
    tpu.vector_store %arg9[%c1_234, %c3_235, %c0_236], %253 {strides = array<i32>} : memref<2x10x16xf32, #tpu.memory_space<vmem>>, vector<1x4x16xf32>,
    %cst_237 = arith.constant 0.000000e+00 : f32
    %254 = vector.broadcast %cst_237 : f32 to vector<4x16xf32>
    %c0_238 = arith.constant 0 : index
    %c0_239 = arith.constant 0 : index
    %c0_240 = arith.constant 0 : index
    %255 = vector.load %arg9[%c0_238, %c0_239, %c0_240] : memref<2x10x16xf32, #tpu.memory_space<vmem>>, vector<2x4x16xf32>
    %256 = vector.extract_strided_slice %255 {offsets = [0, 0, 0], sizes = [1, 4, 16], strides = [1, 1, 1]} : vector<2x4x16xf32> to vector<1x4x16xf32>
    %257 = vector.shape_cast %256 : vector<1x4x16xf32> to vector<4x16xf32>
    %c0_241 = arith.constant 0 : index
    %c0_242 = arith.constant 0 : index
    %c0_243 = arith.constant 0 : index
    %c0_244 = arith.constant 0 : index
    %258 = vector.load %arg4[%c0_241, %c0_242, %c0_243, %c0_244] : memref<7x2x16x16xf32, #tpu.memory_space<vmem>>, vector<1x1x16x16xf32>
    %259 = vector.shape_cast %258 : vector<1x1x16x16xf32> to vector<16x16xf32>
    %cst_245 = arith.constant dense<0.000000e+00> : vector<4x16xf32>
    %260 = tpu.matmul %257, %259, %cst_245 {dimension_numbers = #tpu.dot_dimension_numbers<[1], [0], [0], [1], [0, 0, 1, 1], [], []>} : vector<4x16xf32>, vector<16x16xf32>, vector<4x16xf32> -> vector<4x16xf32>
    %261 = arith.addf %254, %260 : vector<4x16xf32>
    %262 = vector.extract_strided_slice %255 {offsets = [1, 0, 0], sizes = [1, 4, 16], strides = [1, 1, 1]} : vector<2x4x16xf32> to vector<1x4x16xf32>
    %263 = vector.shape_cast %262 : vector<1x4x16xf32> to vector<4x16xf32>
    %c0_246 = arith.constant 0 : index
    %c1_247 = arith.constant 1 : index
    %c0_248 = arith.constant 0 : index
    %c0_249 = arith.constant 0 : index
    %264 = vector.load %arg4[%c0_246, %c1_247, %c0_248, %c0_249] : memref<7x2x16x16xf32, #tpu.memory_space<vmem>>, vector<1x1x16x16xf32>
    %265 = vector.shape_cast %264 : vector<1x1x16x16xf32> to vector<16x16xf32>
    %cst_250 = arith.constant dense<0.000000e+00> : vector<4x16xf32>
    %266 = tpu.matmul %263, %265, %cst_250 {dimension_numbers = #tpu.dot_dimension_numbers<[1], [0], [0], [1], [0, 0, 1, 1], [], []>} : vector<4x16xf32>, vector<16x16xf32>, vector<4x16xf32> -> vector<4x16xf32>
    %267 = arith.addf %261, %266 : vector<4x16xf32>
    %c0_251 = arith.constant 0 : index
    %c1_252 = arith.constant 1 : index
    %c0_253 = arith.constant 0 : index
    %268 = vector.load %arg9[%c0_251, %c1_252, %c0_253] : memref<2x10x16xf32, #tpu.memory_space<vmem>>, vector<2x4x16xf32>
    %269 = vector.extract_strided_slice %268 {offsets = [0, 0, 0], sizes = [1, 4, 16], strides = [1, 1, 1]} : vector<2x4x16xf32> to vector<1x4x16xf32>
    %270 = vector.shape_cast %269 : vector<1x4x16xf32> to vector<4x16xf32>
    %c1_254 = arith.constant 1 : index
    %c0_255 = arith.constant 0 : index
    %c0_256 = arith.constant 0 : index
    %c0_257 = arith.constant 0 : index
    %271 = vector.load %arg4[%c1_254, %c0_255, %c0_256, %c0_257] : memref<7x2x16x16xf32, #tpu.memory_space<vmem>>, vector<1x1x16x16xf32>
    %272 = vector.shape_cast %271 : vector<1x1x16x16xf32> to vector<16x16xf32>
    %cst_258 = arith.constant dense<0.000000e+00> : vector<4x16xf32>
    %273 = tpu.matmul %270, %272, %cst_258 {dimension_numbers = #tpu.dot_dimension_numbers<[1], [0], [0], [1], [0, 0, 1, 1], [], []>} : vector<4x16xf32>, vector<16x16xf32>, vector<4x16xf32> -> vector<4x16xf32>
    %274 = arith.addf %267, %273 : vector<4x16xf32>
    %275 = vector.extract_strided_slice %268 {offsets = [1, 0, 0], sizes = [1, 4, 16], strides = [1, 1, 1]} : vector<2x4x16xf32> to vector<1x4x16xf32>
    %276 = vector.shape_cast %275 : vector<1x4x16xf32> to vector<4x16xf32>
    %c1_259 = arith.constant 1 : index
    %c1_260 = arith.constant 1 : index
    %c0_261 = arith.constant 0 : index
    %c0_262 = arith.constant 0 : index
    %277 = vector.load %arg4[%c1_259, %c1_260, %c0_261, %c0_262] : memref<7x2x16x16xf32, #tpu.memory_space<vmem>>, vector<1x1x16x16xf32>
    %278 = vector.shape_cast %277 : vector<1x1x16x16xf32> to vector<16x16xf32>
    %cst_263 = arith.constant dense<0.000000e+00> : vector<4x16xf32>
    %279 = tpu.matmul %276, %278, %cst_263 {dimension_numbers = #tpu.dot_dimension_numbers<[1], [0], [0], [1], [0, 0, 1, 1], [], []>} : vector<4x16xf32>, vector<16x16xf32>, vector<4x16xf32> -> vector<4x16xf32>
    %280 = arith.addf %274, %279 : vector<4x16xf32>
    %c0_264 = arith.constant 0 : index
    %c2_265 = arith.constant 2 : index
    %c0_266 = arith.constant 0 : index
    %281 = vector.load %arg9[%c0_264, %c2_265, %c0_266] : memref<2x10x16xf32, #tpu.memory_space<vmem>>, vector<2x4x16xf32>
    %282 = vector.extract_strided_slice %281 {offsets = [0, 0, 0], sizes = [1, 4, 16], strides = [1, 1, 1]} : vector<2x4x16xf32> to vector<1x4x16xf32>
    %283 = vector.shape_cast %282 : vector<1x4x16xf32> to vector<4x16xf32>
    %c2_267 = arith.constant 2 : index
    %c0_268 = arith.constant 0 : index
    %c0_269 = arith.constant 0 : index
    %c0_270 = arith.constant 0 : index
    %284 = vector.load %arg4[%c2_267, %c0_268, %c0_269, %c0_270] : memref<7x2x16x16xf32, #tpu.memory_space<vmem>>, vector<1x1x16x16xf32>
    %285 = vector.shape_cast %284 : vector<1x1x16x16xf32> to vector<16x16xf32>
    %cst_271 = arith.constant dense<0.000000e+00> : vector<4x16xf32>
    %286 = tpu.matmul %283, %285, %cst_271 {dimension_numbers = #tpu.dot_dimension_numbers<[1], [0], [0], [1], [0, 0, 1, 1], [], []>} : vector<4x16xf32>, vector<16x16xf32>, vector<4x16xf32> -> vector<4x16xf32>
    %287 = arith.addf %280, %286 : vector<4x16xf32>
    %288 = vector.extract_strided_slice %281 {offsets = [1, 0, 0], sizes = [1, 4, 16], strides = [1, 1, 1]} : vector<2x4x16xf32> to vector<1x4x16xf32>
    %289 = vector.shape_cast %288 : vector<1x4x16xf32> to vector<4x16xf32>
    %c2_272 = arith.constant 2 : index
    %c1_273 = arith.constant 1 : index
    %c0_274 = arith.constant 0 : index
    %c0_275 = arith.constant 0 : index
    %290 = vector.load %arg4[%c2_272, %c1_273, %c0_274, %c0_275] : memref<7x2x16x16xf32, #tpu.memory_space<vmem>>, vector<1x1x16x16xf32>
    %291 = vector.shape_cast %290 : vector<1x1x16x16xf32> to vector<16x16xf32>
    %cst_276 = arith.constant dense<0.000000e+00> : vector<4x16xf32>
    %292 = tpu.matmul %289, %291, %cst_276 {dimension_numbers = #tpu.dot_dimension_numbers<[1], [0], [0], [1], [0, 0, 1, 1], [], []>} : vector<4x16xf32>, vector<16x16xf32>, vector<4x16xf32> -> vector<4x16xf32>
    %293 = arith.addf %287, %292 : vector<4x16xf32>
    %c0_277 = arith.constant 0 : index
    %c3_278 = arith.constant 3 : index
    %c0_279 = arith.constant 0 : index
    %294 = vector.load %arg9[%c0_277, %c3_278, %c0_279] : memref<2x10x16xf32, #tpu.memory_space<vmem>>, vector<2x4x16xf32>
    %295 = vector.extract_strided_slice %294 {offsets = [0, 0, 0], sizes = [1, 4, 16], strides = [1, 1, 1]} : vector<2x4x16xf32> to vector<1x4x16xf32>
    %296 = vector.shape_cast %295 : vector<1x4x16xf32> to vector<4x16xf32>
    %c3_280 = arith.constant 3 : index
    %c0_281 = arith.constant 0 : index
    %c0_282 = arith.constant 0 : index
    %c0_283 = arith.constant 0 : index
    %297 = vector.load %arg4[%c3_280, %c0_281, %c0_282, %c0_283] : memref<7x2x16x16xf32, #tpu.memory_space<vmem>>, vector<1x1x16x16xf32>
    %298 = vector.shape_cast %297 : vector<1x1x16x16xf32> to vector<16x16xf32>
    %cst_284 = arith.constant dense<0.000000e+00> : vector<4x16xf32>
    %299 = tpu.matmul %296, %298, %cst_284 {dimension_numbers = #tpu.dot_dimension_numbers<[1], [0], [0], [1], [0, 0, 1, 1], [], []>} : vector<4x16xf32>, vector<16x16xf32>, vector<4x16xf32> -> vector<4x16xf32>
    %300 = arith.addf %293, %299 : vector<4x16xf32>
    %301 = vector.extract_strided_slice %294 {offsets = [1, 0, 0], sizes = [1, 4, 16], strides = [1, 1, 1]} : vector<2x4x16xf32> to vector<1x4x16xf32>
    %302 = vector.shape_cast %301 : vector<1x4x16xf32> to vector<4x16xf32>
    %c3_285 = arith.constant 3 : index
    %c1_286 = arith.constant 1 : index
    %c0_287 = arith.constant 0 : index
    %c0_288 = arith.constant 0 : index
    %303 = vector.load %arg4[%c3_285, %c1_286, %c0_287, %c0_288] : memref<7x2x16x16xf32, #tpu.memory_space<vmem>>, vector<1x1x16x16xf32>
    %304 = vector.shape_cast %303 : vector<1x1x16x16xf32> to vector<16x16xf32>
    %cst_289 = arith.constant dense<0.000000e+00> : vector<4x16xf32>
    %305 = tpu.matmul %302, %304, %cst_289 {dimension_numbers = #tpu.dot_dimension_numbers<[1], [0], [0], [1], [0, 0, 1, 1], [], []>} : vector<4x16xf32>, vector<16x16xf32>, vector<4x16xf32> -> vector<4x16xf32>
    %306 = arith.addf %300, %305 : vector<4x16xf32>
    %c0_290 = arith.constant 0 : index
    %c4_291 = arith.constant 4 : index
    %c0_292 = arith.constant 0 : index
    %307 = vector.load %arg9[%c0_290, %c4_291, %c0_292] : memref<2x10x16xf32, #tpu.memory_space<vmem>>, vector<2x4x16xf32>
    %308 = vector.extract_strided_slice %307 {offsets = [0, 0, 0], sizes = [1, 4, 16], strides = [1, 1, 1]} : vector<2x4x16xf32> to vector<1x4x16xf32>
    %309 = vector.shape_cast %308 : vector<1x4x16xf32> to vector<4x16xf32>
    %c4_293 = arith.constant 4 : index
    %c0_294 = arith.constant 0 : index
    %c0_295 = arith.constant 0 : index
    %c0_296 = arith.constant 0 : index
    %310 = vector.load %arg4[%c4_293, %c0_294, %c0_295, %c0_296] : memref<7x2x16x16xf32, #tpu.memory_space<vmem>>, vector<1x1x16x16xf32>
    %311 = vector.shape_cast %310 : vector<1x1x16x16xf32> to vector<16x16xf32>
    %cst_297 = arith.constant dense<0.000000e+00> : vector<4x16xf32>
    %312 = tpu.matmul %309, %311, %cst_297 {dimension_numbers = #tpu.dot_dimension_numbers<[1], [0], [0], [1], [0, 0, 1, 1], [], []>} : vector<4x16xf32>, vector<16x16xf32>, vector<4x16xf32> -> vector<4x16xf32>
    %313 = arith.addf %306, %312 : vector<4x16xf32>
    %314 = vector.extract_strided_slice %307 {offsets = [1, 0, 0], sizes = [1, 4, 16], strides = [1, 1, 1]} : vector<2x4x16xf32> to vector<1x4x16xf32>
    %315 = vector.shape_cast %314 : vector<1x4x16xf32> to vector<4x16xf32>
    %c4_298 = arith.constant 4 : index
    %c1_299 = arith.constant 1 : index
    %c0_300 = arith.constant 0 : index
    %c0_301 = arith.constant 0 : index
    %316 = vector.load %arg4[%c4_298, %c1_299, %c0_300, %c0_301] : memref<7x2x16x16xf32, #tpu.memory_space<vmem>>, vector<1x1x16x16xf32>
    %317 = vector.shape_cast %316 : vector<1x1x16x16xf32> to vector<16x16xf32>
    %cst_302 = arith.constant dense<0.000000e+00> : vector<4x16xf32>
    %318 = tpu.matmul %315, %317, %cst_302 {dimension_numbers = #tpu.dot_dimension_numbers<[1], [0], [0], [1], [0, 0, 1, 1], [], []>} : vector<4x16xf32>, vector<16x16xf32>, vector<4x16xf32> -> vector<4x16xf32>
    %319 = arith.addf %313, %318 : vector<4x16xf32>
    %c0_303 = arith.constant 0 : index
    %c5_304 = arith.constant 5 : index
    %c0_305 = arith.constant 0 : index
    %320 = vector.load %arg9[%c0_303, %c5_304, %c0_305] : memref<2x10x16xf32, #tpu.memory_space<vmem>>, vector<2x4x16xf32>
    %321 = vector.extract_strided_slice %320 {offsets = [0, 0, 0], sizes = [1, 4, 16], strides = [1, 1, 1]} : vector<2x4x16xf32> to vector<1x4x16xf32>
    %322 = vector.shape_cast %321 : vector<1x4x16xf32> to vector<4x16xf32>
    %c5_306 = arith.constant 5 : index
    %c0_307 = arith.constant 0 : index
    %c0_308 = arith.constant 0 : index
    %c0_309 = arith.constant 0 : index
    %323 = vector.load %arg4[%c5_306, %c0_307, %c0_308, %c0_309] : memref<7x2x16x16xf32, #tpu.memory_space<vmem>>, vector<1x1x16x16xf32>
    %324 = vector.shape_cast %323 : vector<1x1x16x16xf32> to vector<16x16xf32>
    %cst_310 = arith.constant dense<0.000000e+00> : vector<4x16xf32>
    %325 = tpu.matmul %322, %324, %cst_310 {dimension_numbers = #tpu.dot_dimension_numbers<[1], [0], [0], [1], [0, 0, 1, 1], [], []>} : vector<4x16xf32>, vector<16x16xf32>, vector<4x16xf32> -> vector<4x16xf32>
    %326 = arith.addf %319, %325 : vector<4x16xf32>
    %327 = vector.extract_strided_slice %320 {offsets = [1, 0, 0], sizes = [1, 4, 16], strides = [1, 1, 1]} : vector<2x4x16xf32> to vector<1x4x16xf32>
    %328 = vector.shape_cast %327 : vector<1x4x16xf32> to vector<4x16xf32>
    %c5_311 = arith.constant 5 : index
    %c1_312 = arith.constant 1 : index
    %c0_313 = arith.constant 0 : index
    %c0_314 = arith.constant 0 : index
    %329 = vector.load %arg4[%c5_311, %c1_312, %c0_313, %c0_314] : memref<7x2x16x16xf32, #tpu.memory_space<vmem>>, vector<1x1x16x16xf32>
    %330 = vector.shape_cast %329 : vector<1x1x16x16xf32> to vector<16x16xf32>
    %cst_315 = arith.constant dense<0.000000e+00> : vector<4x16xf32>
    %331 = tpu.matmul %328, %330, %cst_315 {dimension_numbers = #tpu.dot_dimension_numbers<[1], [0], [0], [1], [0, 0, 1, 1], [], []>} : vector<4x16xf32>, vector<16x16xf32>, vector<4x16xf32> -> vector<4x16xf32>
    %332 = arith.addf %326, %331 : vector<4x16xf32>
    %c0_316 = arith.constant 0 : index
    %c6_317 = arith.constant 6 : index
    %c0_318 = arith.constant 0 : index
    %333 = vector.load %arg9[%c0_316, %c6_317, %c0_318] : memref<2x10x16xf32, #tpu.memory_space<vmem>>, vector<2x4x16xf32>
    %334 = vector.extract_strided_slice %333 {offsets = [0, 0, 0], sizes = [1, 4, 16], strides = [1, 1, 1]} : vector<2x4x16xf32> to vector<1x4x16xf32>
    %335 = vector.shape_cast %334 : vector<1x4x16xf32> to vector<4x16xf32>
    %c6_319 = arith.constant 6 : index
    %c0_320 = arith.constant 0 : index
    %c0_321 = arith.constant 0 : index
    %c0_322 = arith.constant 0 : index
    %336 = vector.load %arg4[%c6_319, %c0_320, %c0_321, %c0_322] : memref<7x2x16x16xf32, #tpu.memory_space<vmem>>, vector<1x1x16x16xf32>
    %337 = vector.shape_cast %336 : vector<1x1x16x16xf32> to vector<16x16xf32>
    %cst_323 = arith.constant dense<0.000000e+00> : vector<4x16xf32>
    %338 = tpu.matmul %335, %337, %cst_323 {dimension_numbers = #tpu.dot_dimension_numbers<[1], [0], [0], [1], [0, 0, 1, 1], [], []>} : vector<4x16xf32>, vector<16x16xf32>, vector<4x16xf32> -> vector<4x16xf32>
    %339 = arith.addf %332, %338 : vector<4x16xf32>
    %340 = vector.extract_strided_slice %333 {offsets = [1, 0, 0], sizes = [1, 4, 16], strides = [1, 1, 1]} : vector<2x4x16xf32> to vector<1x4x16xf32>
    %341 = vector.shape_cast %340 : vector<1x4x16xf32> to vector<4x16xf32>
    %c6_324 = arith.constant 6 : index
    %c1_325 = arith.constant 1 : index
    %c0_326 = arith.constant 0 : index
    %c0_327 = arith.constant 0 : index
    %342 = vector.load %arg4[%c6_324, %c1_325, %c0_326, %c0_327] : memref<7x2x16x16xf32, #tpu.memory_space<vmem>>, vector<1x1x16x16xf32>
    %343 = vector.shape_cast %342 : vector<1x1x16x16xf32> to vector<16x16xf32>
    %cst_328 = arith.constant dense<0.000000e+00> : vector<4x16xf32>
    %344 = tpu.matmul %341, %343, %cst_328 {dimension_numbers = #tpu.dot_dimension_numbers<[1], [0], [0], [1], [0, 0, 1, 1], [], []>} : vector<4x16xf32>, vector<16x16xf32>, vector<4x16xf32> -> vector<4x16xf32>
    %345 = arith.addf %339, %344 : vector<4x16xf32>
    %c4_329 = arith.constant 4 : index
    %346 = memref.load %arg1[%c4_329] : memref<6xf32, #tpu.memory_space<smem>>
    %347 = vector.broadcast %346 : f32 to vector<4x16xf32>
    %348 = arith.mulf %345, %347 : vector<4x16xf32>
    %c5_330 = arith.constant 5 : index
    %349 = memref.load %arg1[%c5_330] : memref<6xf32, #tpu.memory_space<smem>>
    %350 = vector.broadcast %349 : f32 to vector<4x16xf32>
    %351 = arith.addf %348, %350 : vector<4x16xf32>
    %352 = arith.negf %351 : vector<4x16xf32>
    %353 = math.exp %352 : vector<4x16xf32>
    %cst_331 = arith.constant 1.000000e+00 : f32
    %354 = vector.broadcast %cst_331 : f32 to vector<4x16xf32>
    %355 = arith.addf %354, %353 : vector<4x16xf32>
    %356 = arith.divf %354, %355 : vector<4x16xf32>
    %cst_332 = arith.constant 0.333333343 : f32
    %357 = vector.broadcast %cst_332 : f32 to vector<4x16xf32>
    %358 = arith.mulf %356, %357 : vector<4x16xf32>
    %359 = vector.shape_cast %128 : vector<16x16xf32> to vector<1x16x16xf32>
    %360 = vector.shape_cast %243 : vector<4x16xf32> to vector<4x1x16xf32>
    %361 = vector.broadcast %359 : vector<1x16x16xf32> to vector<4x16x16xf32>
    %362 = vector.broadcast %360 : vector<4x1x16xf32> to vector<4x16x16xf32>
    %363 = arith.addf %361, %362 : vector<4x16x16xf32>
    %364 = vector.shape_cast %358 : vector<4x16xf32> to vector<4x16x1xf32>
    %365 = vector.broadcast %364 : vector<4x16x1xf32> to vector<4x16x16xf32>
    %366 = arith.addf %363, %365 : vector<4x16x16xf32>
    %367 = arith.mulf %1, %366 : vector<4x16x16xf32>
    %c0_333 = arith.constant 0 : index
    %c0_334 = arith.constant 0 : index
    %c0_335 = arith.constant 0 : index
    %c0_336 = arith.constant 0 : index
    %368 = vector.load %arg6[%c0_333, %c0_334, %c0_335, %c0_336] : memref<1x4x16x16xf32, #tpu.memory_space<vmem>>, vector<1x4x16x16xf32>
    %369 = vector.shape_cast %368 : vector<1x4x16x16xf32> to vector<4x16x16xf32>
    %370 = vector.shape_cast %367 : vector<4x16x16xf32> to vector<1x4x16x16xf32>
    tpu.vector_store %arg6[%c0_333, %c0_334, %c0_335, %c0_336], %370 {strides = array<i32>} : memref<1x4x16x16xf32, #tpu.memory_space<vmem>>, vector<1x4x16x16xf32>,
    return
  }
  func.func @transform_0(%arg0: i32) -> i32 {
    %c0_i32 = arith.constant 0 : i32
    %c0_i32_0 = arith.constant 0 : i32
    return %c0_i32 : i32
  }
  func.func @transform_1(%arg0: i32) -> (i32, i32, i32, i32) {
    %c0_i32 = arith.constant 0 : i32
    %c0_i32_0 = arith.constant 0 : i32
    %c0_i32_1 = arith.constant 0 : i32
    %c0_i32_2 = arith.constant 0 : i32
    %c0_i32_3 = arith.constant 0 : i32
    return %c0_i32, %c0_i32_0, %c0_i32_1, %c0_i32_2 : i32, i32, i32, i32
  }
  func.func @transform_2(%arg0: i32) -> (i32, i32, i32, i32) {
    %c0_i32 = arith.constant 0 : i32
    %c0_i32_0 = arith.constant 0 : i32
    %c0_i32_1 = arith.constant 0 : i32
    %c0_i32_2 = arith.constant 0 : i32
    %c0_i32_3 = arith.constant 0 : i32
    return %c0_i32, %c0_i32_0, %c0_i32_1, %c0_i32_2 : i32, i32, i32, i32
  }
  func.func @transform_3(%arg0: i32) -> (i32, i32, i32, i32) {
    %c0_i32 = arith.constant 0 : i32
    %c0_i32_0 = arith.constant 0 : i32
    %c0_i32_1 = arith.constant 0 : i32
    %c0_i32_2 = arith.constant 0 : i32
    %c0_i32_3 = arith.constant 0 : i32
    return %c0_i32, %c0_i32_0, %c0_i32_1, %c0_i32_2 : i32, i32, i32, i32
  }
  func.func @transform_4(%arg0: i32) -> (i32, i32, i32, i32) {
    %c0_i32 = arith.constant 0 : i32
    %c0_i32_0 = arith.constant 0 : i32
    %c0_i32_1 = arith.constant 0 : i32
    %c0_i32_2 = arith.constant 0 : i32
    return %arg0, %c0_i32, %c0_i32_0, %c0_i32_1 : i32, i32, i32, i32
  }
  func.func @transform_5(%arg0: i32) -> (i32, i32, i32, i32) {
    %c0_i32 = arith.constant 0 : i32
    %c0_i32_0 = arith.constant 0 : i32
    %c0_i32_1 = arith.constant 0 : i32
    %c0_i32_2 = arith.constant 0 : i32
    return %arg0, %c0_i32, %c0_i32_0, %c0_i32_1 : i32, i32, i32, i32
  }
}

</mosaic_0001>

<bundles_post_ra>
// kernel: _lambda_.1
= control target key start
LH: loop header
LB: loop body
LE: loop exit
PB: predicated region body
PF: predicated region fallthrough
CT: control target
= control target key end

     0   :  { %10 = vsyncpa [#allocation7], 0  ;;  %s3015_s0 = inlined_call_operand.vmem [shape: f32[6], index: 0, kind: input, shape index: {}]   ;;  %s3016_s1 = inlined_call_operand.vmem [shape: f32[7,2,16,16], index: 1, kind: input, shape index: {}]   ;;  %s3017_s2 = inlined_call_operand.vmem [shape: f32[7,2,16,16], index: 2, kind: input, shape index: {}]   ;;  %s3018_s3 = inlined_call_operand.vmem [shape: f32[7,2,16,16], index: 3, kind: input, shape index: {}]   ;;  %s3019_s4 = inlined_call_operand.vmem [shape: f32[2,4,16,16], index: 4, kind: input, shape index: {}]   ;;  %s3020_s5 = inlined_call_operand.hbm [shape: f32[2,4,16,16], index: 5, kind: output, shape index: {}]  }
   0x1   :  { %11 = vsyncpa [#allocation6], 0 }
   0x2   :  { %13 = vsyncpa [#allocation6 + $0x1], 0  ;;  %s2392_s18 = smov 0   ;;  %s2394_s19 = smov 0  }
   0x3   :  { %s2396_s20 = smov 0   ;;  %s2398_s21 = smov 0  }
   0x4 LB: > { %s2413_s22 = sadd.s32 4294967295, %s2356_s21   ;;  %s2035_s23 = sadd.s32 4294967294, %s2356_s21   ;;  %s2356_s21 = sphi %s2398_s21, %s3028_s21   ;;  %s2352_s20 = sphi %s2396_s20, %s3027_s20   ;;  %s2348_s19 = sphi %s2394_s19, %s3026_s19   ;;  %s2344_s18 = sphi %s2392_s18, %s3025_s18  }
   0x5   : > { %s2417_s24 = sadd.s32 1, %s2356_s21   ;;  %s136_s25 = sadd.s32 1, %s2352_s20 }
   0x6   : > { %s133_s26 = ssub.s32 %s2356_s21, %s2417_s24  ;;  %p146_p0 = scmp.ne.s32.totalorder %s2352_s20, %s2348_s19 }
   0x7   : > { %p134_p1 = scmp.eq.s32.totalorder %s133_s26, 0  ;;  %p147_p2 = scmp.eq.s32.totalorder %s2413_s22, 1 }
   0x8   : > { %p152_p3 = scmp.ne.s32.totalorder %s2348_s19, %s2344_s18  ;;  %p153_p4 = scmp.eq.s32.totalorder %s2035_s23, 1 }
   0x9   : > { %s2428_s27 = scalar_select %p134_p1, %s2352_s20, %s136_s25  }
   0xa   : > { %p2430_p5 = por %p147_p2, %p146_p0  ;;  %p2434_p6 = por %p153_p4, %p152_p3 }
   0xb   : > { %p2036_p7 = scmp.ge.s32.totalorder %s2356_s21, 1  ;;  %p160_p8 = scmp.lt.s32.totalorder %s2356_s21, 3 }
   0xc   : > { %p2208_p9 = scmp.eq.s32.totalorder %s2413_s22, 0  ;;  %s172_s7 = sshll.u32 %s3015_s0, 4  ;;  %s173_s7 = int_to_ptr.vmem [resolvable:$true] %s172_s7 }
   0xd   : > { %p161_p10 = pnand %p2036_p7, %p160_p8  ;;  %s2358_s8 = smov [#allocation5]  }
   0xf   : > { %p2200_p11 = pneg %p161_p10  ;;  %202 = sbr.rel (%p161_p10) target bundleno = 535 (0x217), region = 40 }
  0x11   : > { %p2201_p12 = pnand %p2208_p9, %p2200_p11 }
  0x13   : > { %2203 = dma.vmem_to_smem (!%p2201_p12), %s173_s7, 16, %s2358_s8, [#allocation7]  }
  0x14   : > { %2335 = dma.done.wait (%p2208_p9), [#allocation7], 16  }
  0x15   : > { %2337 = vsyncadd (%p2208_p9), [#allocation7], 4294967280 }
  0x16   : > { %209 = sfence }
  0x17   : > { %p232_p13 = scmp.lt.s32.totalorder %s2413_s22, 1  ;;  %v2051_v0 = vld [vmem:[%s3016_s1 + $0x28] sm:$0xff]  ;;  %v2045_v1 = vld [vmem:[%s3016_s1 + $0x18] sm:$0xff]  ;;  %v2050_v2 = vld [vmem:[%s3016_s1 + $0x20] sm:$0xff]  ;;  %vm376_vm0 = vcmask 124928   ;;  %v2359_v6 = vmov 0.0  }
  0x18   : > { %480 = vmatpush.msra.mxu2 %v2051_v0  ;;  %415 = vmatpush.msra.mxu0 %v2045_v1  ;;  %v2055_v3 = vld [vmem:[%s3016_s1 + $0x38] sm:$0xff]  ;;  %v2044_v4 = vld [vmem:[%s3016_s1 + $0x10] sm:$0xff]  ;;  %v391_v5 = vld [vmem:[%s3016_s1 + $0x8] sm:$0xff]  ;;  %377 = vst.msk [vmem:[#allocation2] sm:$0x7] %vm376_vm0, %v2359_v6  ;;  %vm245_vm1 = vcmask 130048  }
  0x19   : > { %s233_s30 = scalar_select %p232_p13, %s2413_s22, 1  ;;  %514 = vmatpush.msra.mxu3 %v2055_v3  ;;  %444 = vmatpush.msra.mxu1 %v391_v5  ;;  %v2054_v7 = vld [vmem:[%s3016_s1 + $0x30] sm:$0xff]  ;;  %378 = vst.msk [vmem:[#allocation2 + $0x18] sm:$0x7] %vm376_vm0, %v2359_v6  ;;  %v390_v25 = vld [vmem:[%s3016_s1] sm:$0xff]  ;;  %v2067_v59 = vld [vmem:[%s3016_s1 + $0x68] sm:$0xff] }
  0x1a   : > { %481 = vmatpush.msra.mxu2 %v2050_v2  ;;  %416 = vmatpush.msra.mxu0 %v2044_v4  ;;  %379 = vst.msk [vmem:[#allocation2 + $0x13] sm:$0x7] %vm376_vm0, %v2359_v6  ;;  %v2059_v60 = vld [vmem:[%s3016_s1 + $0x48] sm:$0xff]  ;;  %v2066_v61 = vld [vmem:[%s3016_s1 + $0x60] sm:$0xff]  ;;  %v2071_v2 = vld [vmem:[%s3016_s1 + $0x78] sm:$0xff]  ;;  %vm941_vm2 = vcmask 1041409  }
  0x1b   : > { %s2192_s8 = sshll.u32 %s233_s30, 6  ;;  %515 = vmatpush.msra.mxu3 %v2054_v7  ;;  %380 = vst.msk [vmem:[#allocation2 + $0x2b] sm:$0x7] %vm376_vm0, %v2359_v6  ;;  %445 = vmatpush.msra.mxu1 %v390_v25  ;;  %v2063_v3 = vld [vmem:[%s3016_s1 + $0x58] sm:$0xff]  ;;  %vm943_vm3 = vcmask 1042434   ;;  %vm945_vm4 = vcmask 1043459  }
  0x1c   : > { %s2476_s11 = scalar_lea.vmem %s3019_s4, %s2192_s8  ;;  %933 = vst.msk [vmem:[#allocation3] sm:$0x7] %vm376_vm0, %v2359_v6  ;;  %624 = vmatpush.msrb.mxu2 %v2067_v59  ;;  %552 = vmatpush.msrb.mxu0 %v2059_v60  ;;  %vm948_vm5 = vcmask 125952   ;;  %vm1392_vm6 = vcmask 130112   ;;  %s885_s16 = sld [smem:[#allocation5]] }
  0x1d   : > { %v241_v8 = vld [vmem:[%s2476_s11 + $0x20] sm:$0xff]  ;;  %v239_v9 = vld [vmem:[%s2476_s11 + $0x10] sm:$0xff]  ;;  %v242_v16 = vld [vmem:[%s2476_s11 + $0x28] sm:$0xff]  ;;  %934 = vst.msk [vmem:[#allocation3 + $0x10] sm:$0x7] %vm376_vm0, %v2359_v6  ;;  %658 = vmatpush.msrb.mxu3 %v2071_v2  ;;  %586 = vmatpush.msrb.mxu1 %v2063_v3  ;;  %s2098_s17 = sld [smem:[#allocation5 + $0x1]] }
  0x1e   : > { %v2483_v10 = vld [vmem:[%s2476_s11 + $0x30] sm:$0xff]  ;;  %v2488_v11 = vsel %vm245_vm1, %v241_v8, 0.0  ;;  %v2491_v12 = vsel %vm245_vm1, %v241_v8, -inf  ;;  %v2498_v14 = vsel %vm245_vm1, %v239_v9, 0.0  ;;  %v237_v15 = vld [vmem:[%s2476_s11] sm:$0xff]  ;;  %v2505_v17 = vsel %vm245_vm1, %v239_v9, -inf  ;;  %625 = vmatpush.msrb.mxu2 %v2066_v61 }
  0x1f   : > { %v2495_v13 = vsel %vm245_vm1, %v2483_v10, -inf  ;;  %360 = vadd.xlane.f32.xlu2 %v2488_v11  ;;  %356 = vadd.xlane.f32.xlu1 %v2498_v14  ;;  %v2508_v18 = vsel %vm245_vm1, %v237_v15, 0.0  ;;  %v2511_v19 = vsel %vm245_vm1, %v237_v15, -inf  ;;  %v240_v20 = vld [vmem:[%s2476_s11 + $0x18] sm:$0xff]  ;;  %v2520_v23 = vsel %vm245_vm1, %v242_v16, -inf  ;;  %v238_v30 = vld [vmem:[%s2476_s11 + $0x8] sm:$0xff] }
  0x20   : > { %v251_v21 = vmax.f32 %v2505_v17, %v2495_v13  ;;  %352 = vadd.xlane.f32.xlu0 %v2508_v18  ;;  %v249_v22 = vmax.f32 %v2511_v19, %v2491_v12  ;;  %v2523_v24 = vsel %vm245_vm1, %v242_v16, 0.0  ;;  %v290_v26 = vmax.f32 %v2491_v12, %v2520_v23  ;;  %935 = vst.msk [vmem:[#allocation3 + $0x7] sm:$0x7] %vm376_vm0, %v2359_v6  ;;  %v244_v35 = vld [vmem:[%s2476_s11 + $0x38] sm:$0xff]  ;;  %v2058_v8 = vld [vmem:[%s3016_s1 + $0x40] sm:$0xff]  ;;  %v2083_v61 = vld [vmem:[%s3016_s1 + $0xa8] sm:$0xff] }
  0x21   : > { %v318_v27 = vadd.f32 %v2523_v24, %v2488_v11  ;;  %v2535_v28 = vsel %vm245_vm1, %v240_v20, -inf  ;;  %v268_v29 = vsel %vm245_vm1, %v240_v20, 0.0  ;;  %v2545_v34 = vsel %vm245_vm1, %v238_v30, -inf  ;;  %936 = vst.msk [vmem:[#allocation3 + $0x17] sm:$0x7] %vm376_vm0, %v2359_v6  ;;  %553 = vmatpush.msrb.mxu0 %v2058_v8  ;;  %s2141_s23 = sld [smem:[#allocation5 + $0x2]] }
  0x22   : > { %v252_v31 = vmax.f32 %v249_v22, %v251_v21  ;;  %v283_v32 = vmax.f32 %v2505_v17, %v2535_v28  ;;  %v311_v33 = vadd.f32 %v268_v29, %v2498_v14  ;;  %v291_v36 = vrot.slane %v290_v26, 4  ;;  %1375 = vst.msk [vmem:[#allocation4] sm:$0x7] %vm376_vm0, %v2359_v6  ;;  %v2070_v22 = vld [vmem:[%s3016_s1 + $0x70] sm:$0xff]  ;;  %s2142_s25 = sld [smem:[#allocation5 + $0x3]]  ;;  %s229_s6 = sand.u32 1, %s2348_s19  }
  0x23   : > { %v319_v37 = vrot.slane %v318_v27, 4  ;;  %v256_v38 = vmax.f32 %v2545_v34, %v2520_v23  ;;  %v267_v41 = vsel %vm245_vm1, %v238_v30, 0.0  ;;  %v276_v42 = vmax.f32 %v2511_v19, %v2545_v34  ;;  %1376 = vst.msk [vmem:[#allocation4 + $0x10] sm:$0x7] %vm376_vm0, %v2359_v6  ;;  %659 = vmatpush.msrb.mxu3 %v2070_v22  ;;  %v2102_v22 = vld [vmem:[%s3017_s2 + $0x18] sm:$0xff]  ;;  %s2184_s26 = sld [smem:[#allocation5 + $0x4]] }
  0x24   : > { %381 = vst.msk [vmem:[#allocation2 + $0x3] sm:$0xff] %vm245_vm1, %v252_v31  ;;  %v284_v39 = vrot.slane %v283_v32, 4  ;;  %v312_v40 = vrot.slane %v311_v33, 4  ;;  %v292_v43 = vmax.f32 %v290_v26, %v291_v36  ;;  %v304_v45 = vadd.f32 %v267_v41, %v2508_v18  ;;  %s2185_s30 = sld [smem:[#allocation5 + $0x5]]  ;;  %s2041_s7 = sshll.u32 %s229_s6, 6 }
  0x25   : > { %v320_v44 = vadd.f32 %v319_v37, %v318_v27  ;;  %v2562_v46 = vsel %vm245_vm1, %v244_v35, -inf  ;;  %v277_v49 = vrot.slane %v276_v42, 4  ;;  %1377 = vst.msk [vmem:[#allocation4 + $0x7] sm:$0x7] %vm376_vm0, %v2359_v6  ;;  %v269_v53 = vadd.f32 %v268_v29, %v267_v41  ;;  %s2949_s8 = scalar_lea.vmem [#allocation8], %s2041_s7  ;;  %s2193_s9 = sshll.u32 %s2413_s22, 6 }
  0x26   : > { %v285_v47 = vmax.f32 %v283_v32, %v284_v39  ;;  %v313_v48 = vadd.f32 %v312_v40, %v311_v33  ;;  %v258_v50 = vmax.f32 %v2535_v28, %v2562_v46  ;;  %v293_v51 = vrot.slane %v292_v43, 2  ;;  %1378 = vst.msk [vmem:[#allocation4 + $0x17] sm:$0x7] %vm376_vm0, %v2359_v6  ;;  %s1957_s13 = scalar_lea.hbm %s3020_s5, %s2193_s9  ;;  %s1958_s14 = sshll.u32 %s2949_s8, 4  ;;  %s1959_s14 = int_to_ptr.vmem [resolvable:$true] %s1958_s14 }
  0x27   : > { %362 = vadd.xlane.f32.xlu2 %v2523_v24  ;;  %v321_v52 = vrot.slane %v320_v44, 2  ;;  %358 = vadd.xlane.f32.xlu1 %v268_v29  ;;  %v305_v54 = vrot.slane %v304_v45, 4  ;;  %v278_v57 = vmax.f32 %v276_v42, %v277_v49  ;;  %v297_v58 = vmax.f32 %v2495_v13, %v2562_v46  ;;  %v2062_v42 = vld [vmem:[%s3016_s1 + $0x50] sm:$0xff]  ;;  %s1960_s15 = sshll.u32 %s1957_s13, 4  ;;  %s1946_s22 = scalar_lea.sflag [#allocation6], %s229_s6  ;;  %s1961_s15 = int_to_ptr.hbm [resolvable:$true] %s1960_s15 }
  0x28   : > { %v286_v55 = vrot.slane %v285_v47, 2  ;;  %v314_v56 = vrot.slane %v313_v48, 2  ;;  %354 = vadd.xlane.f32.xlu0 %v267_v41  ;;  %v294_v62 = vmax.f32 %v292_v43, %v293_v51  ;;  %v272_v0 = vsel %vm245_vm1, %v244_v35, 0.0  ;;  %587 = vmatpush.msrb.mxu1 %v2062_v42  ;;  %v2115_v42 = vld [vmem:[%s3017_s2 + $0x58] sm:$0xff] }
  0x29   : > { %v306_v63 = vadd.f32 %v305_v54, %v304_v45  ;;  %v259_v1 = vmax.f32 %v256_v38, %v258_v50  ;;  %v279_v6 = vrot.slane %v278_v57, 2  ;;  %v298_v7 = vrot.slane %v297_v58, 4 }
  0x2a   : > { %v287_v4 = vmax.f32 %v285_v47, %v286_v55  ;;  %v315_v5 = vadd.f32 %v314_v56, %v313_v48  ;;  %v295_v9 = vrot.slane %v294_v62, 1  ;;  %v271_v20 = vadd.f32 %v2523_v24, %v269_v53 }
  0x2b   : > { %v307_v15 = vrot.slane %v306_v63, 2  ;;  %v453_v16 = vld [vmem:[#allocation2 + $0x1] sm:$0xff]  ;;  %382 = vst.msk [vmem:[#allocation2 + $0xb] sm:$0xff] %vm245_vm1, %v259_v1  ;;  %v262_v25 = vadd.f32 %v2498_v14, %v2508_v18  ;;  %v280_v27 = vmax.f32 %v278_v57, %v279_v6  ;;  %v299_v29 = vmax.f32 %v297_v58, %v298_v7  ;;  %v2087_v7 = vld [vmem:[%s3016_s1 + $0xb8] sm:$0xff] }
  0x2c   : > { %v386_v21 = vld [vmem:[#allocation2] sm:$0xff]  ;;  %v288_v26 = vrot.slane %v287_v4, 1  ;;  %2052 = vmatmul.msk.f32.vlgmr.msra.gmra.mxu2 %vm245_vm1, %v453_v16  ;;  %v322_v24 = vadd.f32 %v321_v52, %v320_v44  ;;  %v316_v30 = vrot.slane %v315_v5, 1  ;;  %v273_v32 = vadd.f32 %v272_v0, %v271_v20  ;;  %v2086_v16 = vld [vmem:[%s3016_s1 + $0xb0] sm:$0xff] }
  0x2d   : > { %2048 = vmatmul.msk.f32.vlgmr.msra.gmra.mxu1 %vm245_vm1, %v386_v21  ;;  %v308_v31 = vadd.f32 %v307_v15, %v306_v63  ;;  %v281_v35 = vrot.slane %v280_v27, 1  ;;  %v300_v36 = vrot.slane %v299_v29, 2  ;;  %v296_v37 = vmax.f32 %v294_v62, %v295_v9  ;;  %v597_v63 = vld [vmem:[#allocation2 + $0x3] sm:$0xff]  ;;  %768 = vmatpush.msra.mxu2 %v2083_v61  ;;  %v2078_v15 = vld [vmem:[%s3016_s1 + $0x90] sm:$0xff]  ;;  %v2121_v61 = vld [vmem:[%s3017_s2 + $0x78] sm:$0xff] }
  0x2e   : > { %v289_v33 = vmax.f32 %v287_v4, %v288_v26  ;;  %v275_v14 = vmul.f32 0.25, %v273_v32  ;;  %v265_v18 = vsel %vm245_vm1, %v2483_v10, 0.0  ;;  %v323_v43 = vrot.slane %v322_v24, 1  ;;  %v2075_v4 = vld [vmem:[%s3016_s1 + $0x88] sm:$0xff]  ;;  %v2101_v26 = vld [vmem:[%s3017_s2 + $0x10] sm:$0xff]  ;;  %v2090_v32 = vld [vmem:[%s3016_s1 + $0xc0] sm:$0xff] }
  0x2f   : > { %v309_v38 = vrot.slane %v308_v31, 1  ;;  %366 = vadd.xlane.f32.xlu1 %v272_v0  ;;  %336 = vmax.xlane.f32.xlu2 %v2511_v19  ;;  %v282_v39 = vmax.f32 %v280_v27, %v281_v35  ;;  %v301_v40 = vmax.f32 %v299_v29, %v300_v36  ;;  %v325_v41 = vadd.f32 %v272_v0, %v265_v18  ;;  %v2082_v0 = vld [vmem:[%s3016_s1 + $0xa0] sm:$0xff]  ;;  %v2095_v27 = vld [vmem:[%s3016_s1 + $0xd8] sm:$0xff]  ;;  %v2106_v35 = vld [vmem:[%s3017_s2 + $0x28] sm:$0xff] }
  0x30   : > { %364 = vadd.xlane.f32.xlu0 %v265_v18  ;;  %v317_v44 = vadd.f32 %v316_v30, %v315_v5  ;;  %385 = vst.msk [vmem:[#allocation2 + $0x23] sm:$0xff] %vm245_vm1, %v275_v14  ;;  %v264_v45 = vadd.f32 %v2488_v11, %v262_v25  ;;  %v324_v55 = vadd.f32 %v323_v43, %v322_v24  ;;  %v525_v29 = vld [vmem:[#allocation2 + $0x2] sm:$0xff] }
  0x31   : > { %v310_v10 = vadd.f32 %v309_v38, %v308_v31  ;;  %v942_v19 = vsel %vm941_vm2, %v289_v33, %v282_v39  ;;  %v302_v47 = vrot.slane %v301_v40, 1  ;;  %v326_v48 = vrot.slane %v325_v41, 4  ;;  %769 = vmatpush.msra.mxu2 %v2082_v0  ;;  %v963_v31 = vld [vmem:[%s3017_s2 + $0x8] sm:$0xff]  ;;  %v2094_v33 = vld [vmem:[%s3016_s1 + $0xd0] sm:$0xff]  ;;  %v2105_v38 = vld [vmem:[%s3017_s2 + $0x20] sm:$0xff] }
  0x32   : > { %v454_v49 = vld [vmem:[#allocation2 + $0x9] sm:$0xff]  ;;  %v944_v51 = vsel %vm943_vm3, %v296_v37, %v942_v19  ;;  %v266_v52 = vadd.f32 %v265_v18, %v264_v45  ;;  %v333_v56 = vmul.f32 0.0625, %v317_v44  ;;  %v334_v62 = vmul.f32 0.0625, %v324_v55  ;;  %v962_v37 = vld [vmem:[%s3017_s2] sm:$0xff]  ;;  %v2109_v19 = vld [vmem:[%s3017_s2 + $0x38] sm:$0xff] }
  0x33   : > { %v387_v50 = vld [vmem:[#allocation2 + $0x8] sm:$0xff]  ;;  %v303_v53 = vmax.f32 %v301_v40, %v302_v47  ;;  %v327_v54 = vadd.f32 %v326_v48, %v325_v41  ;;  %v332_v57 = vmul.f32 0.0625, %v310_v10  ;;  %v2117_v43 = vld [vmem:[%s3017_s2 + $0x60] sm:$0xff]  ;;  %v2108_v48 = vld [vmem:[%s3017_s2 + $0x30] sm:$0xff] }
  0x34   : > { %2053 = vmatmul.msk.f32.gmra.mxu2 %vm245_vm1, %v454_v49  ;;  %v274_v11 = vmul.f32 0.25, %v266_v52  ;;  %v741_v25 = vld [vmem:[#allocation2 + $0x5] sm:$0xff]  ;;  %v742_v36 = vld [vmem:[#allocation2 + $0xd] sm:$0xff]  ;;  %v2139_v0 = vld [vmem:[%s3017_s2 + $0xd8] sm:$0xff] }
  0x35   : > { %2049 = vmatmul.msk.f32.gmra.mxu1 %vm245_vm1, %v387_v50  ;;  %v946_v58 = vsel %vm945_vm4, %v303_v53, %v944_v51  ;;  %v328_v59 = vrot.slane %v327_v54, 2  ;;  %v526_v18 = vld [vmem:[#allocation2 + $0xa] sm:$0xff]  ;;  %v2111_v51 = vld [vmem:[%s3017_s2 + $0x40] sm:$0xff]  ;;  %v2127_v53 = vld [vmem:[%s3017_s2 + $0x98] sm:$0xff] }
  0x36   : > { %949 = vst.msk [vmem:[#allocation3 + $0x3] sm:$0xf] %vm948_vm5, %v946_v58  ;;  %v2118_v41 = vld [vmem:[%s3017_s2 + $0x68] sm:$0xff]  ;;  %v2114_v49 = vld [vmem:[%s3017_s2 + $0x50] sm:$0xff] }
  0x37   : > { %340 = vmax.xlane.f32.xlu1 %v2505_v17  ;;  %342 = vmax.xlane.f32.xlu2 %v2535_v28  ;;  %v329_v60 = vadd.f32 %v328_v59, %v327_v54  ;;  %384 = vst.msk [vmem:[#allocation2 + $0x1b] sm:$0xff] %vm245_vm1, %v274_v11  ;;  %v954_v17 = vsel %vm941_vm2, %v333_v56, %v332_v57  ;;  %v2079_v28 = vld [vmem:[%s3016_s1 + $0x98] sm:$0xff]  ;;  %v600_v14 = vld [vmem:[#allocation2 + $0x23] sm:$0xff]  ;;  %v670_v55 = vld [vmem:[#allocation2 + $0xc] sm:$0xff] }
  0x38   : > { %338 = vmax.xlane.f32.xlu0 %v2545_v34  ;;  %730 = vmatpush.msra.mxu1 %v2079_v28  ;;  %v955_v2 = vsel %vm943_vm3, %v334_v62, %v954_v17  ;;  %v672_v39 = vld [vmem:[#allocation2 + $0x24] sm:$0xff]  ;;  %v2126_v57 = vld [vmem:[%s3017_s2 + $0x90] sm:$0xff] }
  0x39   : > { %v330_v1 = vrot.slane %v329_v60, 1  ;;  %v669_v44 = vld [vmem:[#allocation2 + $0x4] sm:$0xff]  ;;  %v2120_v17 = vld [vmem:[%s3017_s2 + $0x70] sm:$0xff] }
  0x3a   : > { %731 = vmatpush.msra.mxu1 %v2078_v15  ;;  %v2112_v47 = vld [vmem:[%s3017_s2 + $0x48] sm:$0xff]  ;;  %v2129_v54 = vld [vmem:[%s3017_s2 + $0xa0] sm:$0xff] }
  0x3b   : > { %v331_v34 = vadd.f32 %v330_v1, %v329_v60  ;;  %v2130_v52 = vld [vmem:[%s3017_s2 + $0xa8] sm:$0xff]  ;;  %v2123_v28 = vld [vmem:[%s3017_s2 + $0x80] sm:$0xff] }
  0x3c   : > { %2068 = vmatmul.msk.f32.vlgmr.msrb.gmra.mxu2 %vm245_vm1, %v597_v63  ;;  %v744_v11 = vld [vmem:[#allocation2 + $0x25] sm:$0xff] }
  0x3d   : > { %v335_v3 = vmul.f32 0.0625, %v331_v34  ;;  %984 = vmatpush.msrb.mxu2 %v2102_v22  ;;  %v1013_v50 = vld [vmem:[#allocation3 + $0x1] sm:$0xf]  ;;  %v816_v56 = vld [vmem:[#allocation2 + $0x26] sm:$0xff]  ;;  %v1237_v1 = vld [vmem:[#allocation3 + $0x5] sm:$0xf] }
  0x3e   : > { %v388_v5 = vld [vmem:[#allocation2 + $0x18] sm:$0xff]  ;;  %v456_v20 = vld [vmem:[#allocation2 + $0x21] sm:$0xff]  ;;  %v1125_v58 = vld [vmem:[#allocation3 + $0x3] sm:$0xf] }
  0x3f   : > { %v455_v6 = vld [vmem:[#allocation2 + $0x19] sm:$0xff]  ;;  %346 = vmax.xlane.f32.xlu1 %v2520_v23  ;;  %348 = vmax.xlane.f32.xlu2 %v2495_v13  ;;  %v956_v8 = vsel %vm945_vm4, %v335_v3, %v955_v2  ;;  %v598_v23 = vld [vmem:[#allocation2 + $0xb] sm:$0xff]  ;;  %v528_v21 = vld [vmem:[#allocation2 + $0x22] sm:$0xff] }
  0x40   : > { %2046 = vmatmul.msk.f32.vlgmr.msra.gmra.mxu0 %vm245_vm1, %v388_v5  ;;  %2056 = vmatmul.msk.f32.vlgmr.msra.gmra.mxu3 %vm245_vm1, %v455_v6  ;;  %v527_v9 = vld [vmem:[#allocation2 + $0x1a] sm:$0xff]  ;;  %959 = vst.msk [vmem:[#allocation3 + $0x13] sm:$0xf] %vm948_vm5, %v956_v8  ;;  %v813_v59 = vld [vmem:[#allocation2 + $0x6] sm:$0xff]  ;;  %v960_v60 = vld [vmem:[#allocation3] sm:$0xf] }
  0x41   : > { %344 = vmax.xlane.f32.xlu0 %v2491_v12  ;;  %2064 = vmatmul.msk.f32.vlgmr.msrb.gmra.mxu1 %vm245_vm1, %v527_v9  ;;  %v2074_v13 = vld [vmem:[%s3016_s1 + $0x80] sm:$0xff]  ;;  %v2124_v63 = vld [vmem:[%s3017_s2 + $0x88] sm:$0xff]  ;;  %v2138_v34 = vld [vmem:[%s3017_s2 + $0xd0] sm:$0xff] }
  0x42   : > { %696 = vmatpush.msra.mxu0 %v2075_v4  ;;  %802 = vmatpush.msra.mxu3 %v2087_v7  ;;  %v389_v12 = vld [vmem:[#allocation2 + $0x20] sm:$0xff]  ;;  %v814_v2 = vld [vmem:[#allocation2 + $0xe] sm:$0xff]  ;;  %v2133_v4 = vld [vmem:[%s3017_s2 + $0xb8] sm:$0xff] }
  0x43   : > { %874 = vmatpush.msrb.mxu1 %v2095_v27  ;;  %v599_v24 = vld [vmem:[#allocation2 + $0x1b] sm:$0xff]  ;;  %985 = vmatpush.msrb.mxu2 %v2101_v26  ;;  %v2132_v6 = vld [vmem:[%s3017_s2 + $0xb0] sm:$0xff]  ;;  %v2136_v9 = vld [vmem:[%s3017_s2 + $0xc8] sm:$0xff] }
  0x44   : > { %2069 = vmatmul.msk.f32.gmra.mxu2 %vm245_vm1, %v598_v23  ;;  %697 = vmatpush.msra.mxu0 %v2074_v13  ;;  %v671_v30 = vld [vmem:[#allocation2 + $0x1c] sm:$0xff]  ;;  %v1069_v7 = vld [vmem:[#allocation3 + $0x2] sm:$0xf] }
  0x45   : > { %803 = vmatpush.msra.mxu3 %v2086_v16  ;;  %875 = vmatpush.msrb.mxu1 %v2094_v33  ;;  %v743_v45 = vld [vmem:[#allocation2 + $0x1d] sm:$0xff]  ;;  %v1181_v15 = vld [vmem:[#allocation3 + $0x4] sm:$0xf] }
  0x46   : > { %v815_v10 = vld [vmem:[#allocation2 + $0x1e] sm:$0xff] }
  0x47   : > { %v961_v40 = vld [vmem:[#allocation3 + $0x10] sm:$0xf]  ;;  %v1182_v5 = vld [vmem:[#allocation3 + $0x14] sm:$0xf] }
  0x48   : > { %2047 = vmatmul.msk.f32.gmra.mxu0 %vm245_vm1, %v389_v12  ;;  %2057 = vmatmul.msk.f32.gmra.mxu3 %vm245_vm1, %v456_v20  ;;  %v1070_v62 = vld [vmem:[#allocation3 + $0x12] sm:$0xf]  ;;  %v1294_v23 = vld [vmem:[#allocation3 + $0x16] sm:$0xf]  ;;  %v1293_v12 = vld [vmem:[#allocation3 + $0x6] sm:$0xf] }
  0x49   : > { %350 = vmax.xlane.f32.xlu0 %v2562_v46  ;;  %2065 = vmatmul.msk.f32.gmra.mxu1 %vm245_vm1, %v528_v21  ;;  %v2091_v46 = vld [vmem:[%s3016_s1 + $0xc8] sm:$0xff]  ;;  %v1014_v3 = vld [vmem:[#allocation3 + $0x11] sm:$0xf] }
  0x4a   : > { %v1126_v8 = vld [vmem:[#allocation3 + $0x13] sm:$0xf] }
  0x4b   : > { %v2135_v13 = vld [vmem:[%s3017_s2 + $0xc0] sm:$0xff] }
  0x4c   : > { %2084 = vmatmul.msk.f32.vlgmr.msra.gmra.mxu2 %vm245_vm1, %v741_v25  ;;  %v1238_v16 = vld [vmem:[#allocation3 + $0x15] sm:$0xf]  ;;  %v1387_v25 = vlaneseq }
  0x4d   : > { %1035 = vmatpush.msra.mxu2 %v2106_v35 }
  0x4e   : > { %v2786_v26 = vand.u32 127, %v1387_v25 }
  0x4f   : > { %1036 = vmatpush.msra.mxu2 %v2105_v38 }
  0x50   : > { %2060 = vmatmul.msk.f32.vlgmr.msrb.gmra.mxu0 %vm245_vm1, %v525_v29  ;;  %2072 = vmatmul.msk.f32.vlgmr.msrb.gmra.mxu3 %vm245_vm1, %v599_v24  ;;  %v2789_v29 = vadd.s32 4294967288, %v2786_v26 }
  0x51   : > { %2080 = vmatmul.msk.f32.vlgmr.msra.gmra.mxu1 %vm245_vm1, %v671_v30  ;;  %840 = vmatpush.msrb.mxu0 %v2091_v46 }
  0x52   : > { %1007 = vmatpush.msrb.mxu3 %v963_v31  ;;  %1118 = vmatpush.msra.mxu1 %v2115_v42  ;;  %v2151_v42 = vld [vmem:[%s3018_s3 + $0x30] sm:$0xff] }
  0x53   : > { %841 = vmatpush.msrb.mxu0 %v2090_v32 }
  0x54   : > { %2085 = vmatmul.msk.f32.gmra.mxu2 %vm245_vm1, %v742_v36  ;;  %1008 = vmatpush.msrb.mxu3 %v962_v37 }
  0x55   : > { %1119 = vmatpush.msra.mxu1 %v2114_v49 }
  0x58   : > { %2073 = vmatmul.msk.f32.gmra.mxu3 %vm245_vm1, %v600_v14  ;;  %2061 = vmatmul.msk.f32.gmra.mxu0 %vm245_vm1, %v526_v18  ;;  %v2145_v18 = vld [vmem:[%s3018_s3 + $0x18] sm:$0xff] }
  0x59   : > { %2081 = vmatmul.msk.f32.gmra.mxu1 %vm245_vm1, %v672_v39  ;;  %v2152_v39 = vld [vmem:[%s3018_s3 + $0x38] sm:$0xff] }
  0x5c   : > { %2103 = vmatmul.msk.f32.vlgmr.msrb.gmra.mxu2 %vm245_vm1, %v961_v40 }
  0x5d   : > { %1147 = vmatpush.msrb.mxu2 %v2118_v41  ;;  %v2144_v41 = vld [vmem:[%s3018_s3 + $0x10] sm:$0xff] }
  0x5f   : > { %1148 = vmatpush.msrb.mxu2 %v2117_v43 }
  0x60   : > { %2076 = vmatmul.msk.f32.vlgmr.msra.gmra.mxu0 %vm245_vm1, %v669_v44  ;;  %2088 = vmatmul.msk.f32.vlgmr.msra.gmra.mxu3 %vm245_vm1, %v743_v45 }
  0x61   : > { %2096 = vmatmul.msk.f32.vlgmr.msrb.gmra.mxu1 %vm245_vm1, %v815_v10  ;;  %1062 = vmatpush.msra.mxu3 %v2109_v19 }
  0x62   : > { %1091 = vmatpush.msra.mxu0 %v2112_v47  ;;  %1230 = vmatpush.msrb.mxu1 %v2127_v53 }
  0x63   : > { %1063 = vmatpush.msra.mxu3 %v2108_v48 }
  0x64   : > { %2107 = vmatmul.msk.f32.vlgmr.msra.gmra.mxu2 %vm245_vm1, %v1013_v50  ;;  %1092 = vmatpush.msra.mxu0 %v2111_v51 }
  0x65   : > { %1259 = vmatpush.msra.mxu2 %v2130_v52  ;;  %1231 = vmatpush.msrb.mxu1 %v2126_v57  ;;  %v2163_v57 = vld [vmem:[%s3018_s3 + $0x70] sm:$0xff] }
  0x67   : > { %1260 = vmatpush.msra.mxu2 %v2129_v54 }
  0x68   : > { %2077 = vmatmul.msk.f32.gmra.mxu0 %vm245_vm1, %v670_v55  ;;  %2089 = vmatmul.msk.f32.gmra.mxu3 %vm245_vm1, %v744_v11  ;;  %v2164_v55 = vld [vmem:[%s3018_s3 + $0x78] sm:$0xff] }
  0x69   : > { %2097 = vmatmul.msk.f32.gmra.mxu1 %vm245_vm1, %v816_v56 }
  0x6c   : > { %2119 = vmatmul.msk.f32.vlgmr.msrb.gmra.mxu2 %vm245_vm1, %v1125_v58 }
  0x6d   : > { %1458 = vmatpush.msrb.mxu2 %v2145_v18 }
  0x6f   : > { %1459 = vmatpush.msrb.mxu2 %v2144_v41  ;;  %v2166_v41 = vld [vmem:[%s3018_s3 + $0x80] sm:$0xff] }
  0x70   : > { %2092 = vmatmul.msk.f32.vlgmr.msrb.gmra.mxu0 %vm245_vm1, %v813_v59  ;;  %2104 = vmatmul.msk.f32.vlgmr.msrb.gmra.mxu3 %vm245_vm1, %v960_v60 }
  0x71   : > { %1174 = vmatpush.msrb.mxu3 %v2121_v61  ;;  %2116 = vmatmul.msk.f32.vlgmr.msra.gmra.mxu1 %vm245_vm1, %v1070_v62 }
  0x72   : > { %1203 = vmatpush.msrb.mxu0 %v2124_v63  ;;  %1342 = vmatpush.msra.mxu1 %v2139_v0  ;;  %v2176_v0 = vld [vmem:[%s3018_s3 + $0xb8] sm:$0xff] }
  0x73   : > { %1175 = vmatpush.msrb.mxu3 %v2120_v17  ;;  %v1437_v17 = vld [vmem:[%s3018_s3 + $0x8] sm:$0xff] }
  0x74   : > { %2131 = vmatmul.msk.f32.vlgmr.msra.gmra.mxu2 %vm245_vm1, %v1237_v1  ;;  %1204 = vmatpush.msrb.mxu0 %v2123_v28 }
  0x75   : > { %1343 = vmatpush.msra.mxu1 %v2138_v34  ;;  %v2175_v34 = vld [vmem:[%s3018_s3 + $0xb0] sm:$0xff] }
  0x78   : > { %2093 = vmatmul.msk.f32.gmra.mxu0 %vm245_vm1, %v814_v2  ;;  %2110 = vmatmul.msk.f32.vlgmr.msra.gmra.mxu3 %vm245_vm1, %v1014_v3 }
  0x79   : > { %1286 = vmatpush.msra.mxu3 %v2133_v4  ;;  %2128 = vmatmul.msk.f32.vlgmr.msrb.gmra.mxu1 %vm245_vm1, %v1182_v5  ;;  %v1436_v4 = vld [vmem:[%s3018_s3] sm:$0xff]  ;;  %v2149_v5 = vld [vmem:[%s3018_s3 + $0x28] sm:$0xff] }
  0x7a   : > { %1536 = vmatpush.msrb.mxu1 %v2152_v39 }
  0x7b   : > { %1287 = vmatpush.msra.mxu3 %v2132_v6  ;;  %v2155_v6 = vld [vmem:[%s3018_s3 + $0x48] sm:$0xff] }
  0x7c   : > { %1537 = vmatpush.msrb.mxu1 %v2151_v42  ;;  %1565 = vmatpush.msra.mxu2 %v2155_v6 }
  0x80   : > { %2113 = vmatmul.msk.f32.vlgmr.msra.gmra.mxu0 %vm245_vm1, %v1069_v7  ;;  %2122 = vmatmul.msk.f32.vlgmr.msrb.gmra.mxu3 %vm245_vm1, %v1126_v8  ;;  %v2148_v8 = vld [vmem:[%s3018_s3 + $0x20] sm:$0xff] }
  0x81   : > { %1315 = vmatpush.msra.mxu0 %v2136_v9  ;;  %2140 = vmatmul.msk.f32.vlgmr.msra.gmra.mxu1 %vm245_vm1, %v1294_v23  ;;  %v2154_v9 = vld [vmem:[%s3018_s3 + $0x40] sm:$0xff] }
  0x82   : > { %1648 = vmatpush.msra.mxu1 %v2164_v55  ;;  %1481 = vmatpush.msrb.mxu3 %v1437_v17  ;;  %v2182_v17 = vld [vmem:[%s3018_s3 + $0xd8] sm:$0xff] }
  0x83   : > { %1316 = vmatpush.msra.mxu0 %v2135_v13  ;;  %1566 = vmatpush.msra.mxu2 %v2154_v9 }
  0x84   : > { %1649 = vmatpush.msra.mxu1 %v2163_v57  ;;  %1482 = vmatpush.msrb.mxu3 %v1436_v4  ;;  %v2169_v57 = vld [vmem:[%s3018_s3 + $0x90] sm:$0xff] }
  0x85   : > { %v2181_v4 = vld [vmem:[%s3018_s3 + $0xd0] sm:$0xff] }
  0x88   : > { %2125 = vmatmul.msk.f32.vlgmr.msrb.gmra.mxu0 %vm245_vm1, %v1181_v15  ;;  %2134 = vmatmul.msk.f32.vlgmr.msra.gmra.mxu3 %vm245_vm1, %v1238_v16 }
  0x89   : > { %1509 = vmatpush.msrb.mxu0 %v2149_v5 }
  0x8b   : > { %1510 = vmatpush.msrb.mxu0 %v2148_v8 }
  0x90   : > { %2137 = vmatmul.msk.f32.vlgmr.msra.gmra.mxu0 %vm245_vm1, %v1293_v12 }
  0x92   : > { %v361_v20 = vpop.xlane.xlu2 %360  ;;  %v357_v21 = vpop.xlane.xlu1 %356 }
  0x93   : > { %v353_v22 = vpop.xlane.xlu0 %352  ;;  %v370_v27 = vmul.f32 0.0625, %v357_v21  ;;  %v372_v35 = vmul.f32 0.0625, %v361_v20 }
  0x94   : > { %v368_v32 = vmul.f32 0.0625, %v353_v22 }
  0x95   : > { %v1419_v37 = vperm.slane %v370_v27, %v2786_v26  ;;  %v1422_v43 = vperm.slane %v372_v35, %v2786_v26  ;;  %v2158_v27 = vld [vmem:[%s3018_s3 + $0x58] sm:$0xff]  ;;  %v2157_v35 = vld [vmem:[%s3018_s3 + $0x50] sm:$0xff] }
  0x96   : > { %v1416_v40 = vperm.slane %v368_v32, %v2786_v26  ;;  %1592 = vmatpush.msra.mxu3 %v2158_v27 }
  0x98   : > { %1593 = vmatpush.msra.mxu3 %v2157_v35 }
  0x9a   : > { %v363_v24 = vpop.xlane.xlu2 %362  ;;  %v359_v30 = vpop.xlane.xlu1 %358 }
  0x9b   : > { %v371_v46 = vmul.f32 0.0625, %v359_v30  ;;  %v355_v31 = vpop.xlane.xlu0 %354  ;;  %v373_v36 = vmul.f32 0.0625, %v363_v24 }
  0x9c   : > { %v369_v33 = vmul.f32 0.0625, %v355_v31 }
  0x9d   : > { %v1420_v38 = vperm.slane %v371_v46, %v2789_v29  ;;  %v1423_v44 = vperm.slane %v373_v36, %v2789_v29  ;;  %v2161_v36 = vld [vmem:[%s3018_s3 + $0x68] sm:$0xff] }
  0x9e   : > { %v1417_v14 = vperm.slane %v369_v33, %v2789_v29  ;;  %1621 = vmatpush.msra.mxu0 %v2161_v36 }
  0x9f   : > { %v1421_v45 = vsel %vm1392_vm6, %v1420_v38, %v1419_v37  ;;  %v1424_v50 = vsel %vm1392_vm6, %v1423_v44, %v1422_v43  ;;  %v2167_v37 = vld [vmem:[%s3018_s3 + $0x88] sm:$0xff] }
  0xa0   : > { %v1418_v10 = vsel %vm1392_vm6, %v1417_v14, %v1416_v40  ;;  %v2160_v40 = vld [vmem:[%s3018_s3 + $0x60] sm:$0xff] }
  0xa1   : > { %v1428_v51 = vsel %vm941_vm2, %v1421_v45, %v1418_v10  ;;  %1622 = vmatpush.msra.mxu0 %v2160_v40 }
  0xa2   : > { %v367_v19 = vpop.xlane.xlu1 %366  ;;  %v337_v54 = vpop.xlane.xlu2 %336  ;;  %v1429_v11 = vsel %vm943_vm3, %v1424_v50, %v1428_v51  ;;  %v2170_v51 = vld [vmem:[%s3018_s3 + $0x98] sm:$0xff] }
  0xa3   : > { %v375_v47 = vmul.f32 0.0625, %v367_v19  ;;  %v365_v48 = vpop.xlane.xlu0 %364  ;;  %v1389_v23 = vperm.slane %v337_v54, %v2786_v26 }
  0xa4   : > { %v374_v49 = vmul.f32 0.0625, %v365_v48 }
  0xa5   : > { %v1426_v52 = vperm.slane %v375_v47, %v2789_v29 }
  0xa6   : > { %v1425_v53 = vperm.slane %v374_v49, %v2786_v26 }
  0xa8   : > { %v1427_v56 = vsel %vm1392_vm6, %v1426_v52, %v1425_v53  ;;  %v2173_v52 = vld [vmem:[%s3018_s3 + $0xa8] sm:$0xff] }
  0xa9   : > { %v1430_v58 = vsel %vm945_vm4, %v1427_v56, %v1429_v11  ;;  %v2179_v53 = vld [vmem:[%s3018_s3 + $0xc8] sm:$0xff] }
  0xaa   : > { %1433 = vst.msk [vmem:[#allocation4 + $0x13] sm:$0xf] %vm948_vm5, %v1430_v58  ;;  %v447_v59 = vpop.f32.mrf.mxu1  ;;  %v341_v60 = vpop.xlane.xlu1 %340  ;;  %v2172_v58 = vld [vmem:[%s3018_s3 + $0xa0] sm:$0xff] }
  0xab   : > { %v339_v61 = vpop.xlane.xlu0 %338  ;;  %v343_v63 = vpop.xlane.xlu2 %342  ;;  %v1394_v13 = vperm.slane %v341_v60, %v2786_v26 }
  0xac   : > { %v1391_v15 = vperm.slane %v339_v61, %v2789_v29  ;;  %v1395_v16 = vperm.slane %v343_v63, %v2789_v29 }
  0xae   : > { %v1393_v30 = vsel %vm1392_vm6, %v1391_v15, %v1389_v23  ;;  %v1396_v46 = vsel %vm1392_vm6, %v1395_v16, %v1394_v13 }
  0xaf   : > { %v483_v62 = vpop.f32.mrf.mxu2 }
  0xb1   : > { %v1435_v1 = vld [vmem:[#allocation4 + $0x10] sm:$0xf]  ;;  %v1712_v10 = vld [vmem:[#allocation4 + $0x15] sm:$0xf] }
  0xb2   : > { %v1488_v28 = vld [vmem:[#allocation4 + $0x11] sm:$0xf]  ;;  %2146 = vmatmul.msk.f32.vlgmr.msrb.gmra.mxu2 %vm245_vm1, %v1435_v1  ;;  %v450_v3 = vpop.f32.mrf.mxu1  ;;  %v347_v7 = vpop.xlane.xlu1 %346 }
  0xb3   : > { %2153 = vmatmul.msk.f32.vlgmr.msrb.gmra.mxu1 %vm245_vm1, %v1488_v28  ;;  %v1398_v20 = vperm.slane %v347_v7, %v2789_v29  ;;  %v349_v22 = vpop.xlane.xlu2 %348  ;;  %v1600_v24 = vld [vmem:[#allocation4 + $0x13] sm:$0xf]  ;;  %1677 = vmatpush.msrb.mxu2 %v2167_v37 }
  0xb4   : > { %1760 = vmatpush.msrb.mxu1 %v2176_v0  ;;  %v345_v2 = vpop.xlane.xlu0 %344  ;;  %v1400_v31 = vperm.slane %v349_v22, %v2786_v26  ;;  %v1544_v28 = vld [vmem:[#allocation4 + $0x12] sm:$0xf] }
  0xb5   : > { %v1397_v21 = vperm.slane %v345_v2, %v2786_v26  ;;  %v1403_v26 = vsel %vm941_vm2, %v1396_v46, %v1393_v30  ;;  %1678 = vmatpush.msrb.mxu2 %v2166_v41  ;;  %v1656_v15 = vld [vmem:[#allocation4 + $0x14] sm:$0xf] }
  0xb6   : > { %1761 = vmatpush.msrb.mxu1 %v2175_v34 }
  0xb7   : > { %v486_v12 = vpop.f32.mrf.mxu2  ;;  %v1399_v32 = vsel %vm1392_vm6, %v1398_v20, %v1397_v21 }
  0xb8   : > { %v1404_v42 = vsel %vm943_vm3, %v1399_v32, %v1403_v26  ;;  %v1768_v32 = vld [vmem:[#allocation4 + $0x16] sm:$0xf] }
  0xbb   : > { %2165 = vmatmul.msk.f32.vlgmr.msra.gmra.mxu1 %vm245_vm1, %v1600_v24 }
  0xbc   : > { %v351_v33 = vpop.xlane.xlu0 %350 }
  0xbd   : > { %v418_v38 = vpop.f32.mrf.mxu0  ;;  %v1401_v14 = vperm.slane %v351_v33, %v2789_v29 }
  0xbe   : > { %v448_v18 = vadd.f32 %v447_v59, %v418_v38  ;;  %v589_v39 = vpop.f32.mrf.mxu1  ;;  %v2178_v59 = vld [vmem:[%s3018_s3 + $0xc0] sm:$0xff] }
  0xbf   : > { %v1402_v43 = vsel %vm1392_vm6, %v1401_v14, %v1400_v31  ;;  %v627_v45 = vpop.f32.mrf.mxu2 }
  0xc0   : > { %v489_v29 = vadd.f32 %v483_v62, %v448_v18  ;;  %v1405_v44 = vsel %vm945_vm4, %v1402_v43, %v1404_v42 }
  0xc1   : > { %1407 = vst.msk [vmem:[#allocation4 + $0x3] sm:$0xf] %vm948_vm5, %v1405_v44 }
  0xc3   : > { %2177 = vmatmul.msk.f32.vlgmr.msrb.gmra.mxu1 %vm245_vm1, %v1712_v10  ;;  %v517_v19 = vpop.f32.mrf.mxu3 }
  0xc4   : > { %v523_v47 = vadd.f32 %v517_v19, %v489_v29 }
  0xc5   : > { %v421_v48 = vpop.f32.mrf.mxu0 }
  0xc6   : > { %v451_v49 = vadd.f32 %v450_v3, %v421_v48  ;;  %v592_v50 = vpop.f32.mrf.mxu1 }
  0xc7   : > { %v630_v61 = vpop.f32.mrf.mxu2 }
  0xc8   : > { %v490_v54 = vadd.f32 %v486_v12, %v451_v49  ;;  %v1434_v55 = vld [vmem:[#allocation4] sm:$0xf]  ;;  %v1655_v3 = vld [vmem:[#allocation4 + $0x4] sm:$0xf] }
  0xc9   : > { %v1487_v11 = vld [vmem:[#allocation4 + $0x1] sm:$0xf]  ;;  %2147 = vmatmul.msk.f32.vlgmr.msrb.gmra.mxu3 %vm245_vm1, %v1434_v55  ;;  %v1711_v16 = vld [vmem:[#allocation4 + $0x5] sm:$0xf] }
  0xca   : > { %v1543_v56 = vld [vmem:[#allocation4 + $0x2] sm:$0xf]  ;;  %2150 = vmatmul.msk.f32.vlgmr.msrb.gmra.mxu0 %vm245_vm1, %v1487_v11  ;;  %1704 = vmatpush.msrb.mxu3 %v2170_v51  ;;  %v1767_v12 = vld [vmem:[#allocation4 + $0x6] sm:$0xf]  ;;  %v890_v11 = vstv %s2098_s17 }
  0xcb   : > { %2156 = vmatmul.msk.f32.vlgmr.msra.gmra.mxu2 %vm245_vm1, %v1543_v56  ;;  %v520_v60 = vpop.f32.mrf.mxu3  ;;  %1733 = vmatpush.msrb.mxu0 %v2173_v52  ;;  %v1599_v34 = vld [vmem:[#allocation4 + $0x3] sm:$0xf] }
  0xcc   : > { %1789 = vmatpush.msra.mxu2 %v2179_v53  ;;  %v524_v62 = vadd.f32 %v520_v60, %v490_v54  ;;  %1705 = vmatpush.msrb.mxu3 %v2169_v57 }
  0xcd   : > { %v555_v63 = vpop.f32.mrf.mxu0  ;;  %1734 = vmatpush.msrb.mxu0 %v2172_v58 }
  0xce   : > { %1790 = vmatpush.msra.mxu2 %v2178_v59  ;;  %v561_v0 = vadd.f32 %v555_v63, %v523_v47  ;;  %v733_v2 = vpop.f32.mrf.mxu1 }
  0xcf   : > { %v771_v9 = vpop.f32.mrf.mxu2 }
  0xd0   : > { %v595_v1 = vadd.f32 %v589_v39, %v561_v0 }
  0xd1   : > { %2159 = vmatmul.msk.f32.vlgmr.msra.gmra.mxu3 %vm245_vm1, %v1544_v28 }
  0xd2   : > { %2162 = vmatmul.msk.f32.vlgmr.msra.gmra.mxu0 %vm245_vm1, %v1599_v34  ;;  %v633_v5 = vadd.f32 %v627_v45, %v595_v1  ;;  %1816 = vmatpush.msra.mxu3 %v2182_v17 }
  0xd3   : > { %2168 = vmatmul.msk.f32.vlgmr.msrb.gmra.mxu2 %vm245_vm1, %v1655_v3  ;;  %v661_v6 = vpop.f32.mrf.mxu3 }
  0xd4   : > { %v667_v7 = vadd.f32 %v661_v6, %v633_v5  ;;  %1817 = vmatpush.msra.mxu3 %v2181_v4 }
  0xd5   : > { %v558_v8 = vpop.f32.mrf.mxu0 }
  0xd6   : > { %v562_v23 = vadd.f32 %v558_v8, %v524_v62  ;;  %v736_v22 = vpop.f32.mrf.mxu1 }
  0xd7   : > { %v774_v46 = vpop.f32.mrf.mxu2 }
  0xd8   : > { %v596_v13 = vadd.f32 %v592_v50, %v562_v23  ;;  %v886_v50 = vstv %s885_s16  ;;  %s2304_s16 = sshra.s32 %s1961_s15, 4  ;;  %s2305_s16 = int_to_ptr.hbm [resolvable:$true] %s2304_s16 }
  0xd9   : > { %2171 = vmatmul.msk.f32.vlgmr.msrb.gmra.mxu3 %vm245_vm1, %v1656_v15  ;;  %s2306_s17 = scalar_lea.hbm %s2305_s16, 64  ;;  %p2311_p3 = scmp.lt.s32.totalorder %s2305_s16, %s3020_s5 }
  0xda   : > { %2174 = vmatmul.msk.f32.vlgmr.msrb.gmra.mxu0 %vm245_vm1, %v1711_v16  ;;  %v634_v20 = vadd.f32 %v630_v61, %v596_v13  ;;  %p2307_p0 = scmp.ne.s32.totalorder %s2305_s16, %s2306_s17 }
  0xdb   : > { %2180 = vmatmul.msk.f32.vlgmr.msra.gmra.mxu2 %vm245_vm1, %v1767_v12  ;;  %v664_v21 = vpop.f32.mrf.mxu3 }
  0xdc   : > { %v668_v27 = vadd.f32 %v664_v21, %v634_v20  ;;  %v1350_v20 = vstv %s2141_s23  ;;  %p2308_p1 = pnand %p2307_p0, %p2430_p5 }
  0xdd   : > { %v699_v24 = vpop.f32.mrf.mxu0 }
  0xde   : > { %v705_v30 = vadd.f32 %v699_v24, %v667_v7  ;;  %v877_v38 = vpop.f32.mrf.mxu1  ;;  %p2309_p2 = pneg %p2308_p1 }
  0xdf   : > { %v987_v18 = vpop.f32.mrf.mxu2 }
  0xe0   : > { %v739_v31 = vadd.f32 %v733_v2, %v705_v30 }
  0xe1   : > { %2183 = vmatmul.msk.f32.vlgmr.msra.gmra.mxu3 %vm245_vm1, %v1768_v32 }
  0xe2   : > { %v777_v33 = vadd.f32 %v771_v9, %v739_v31 }
  0xe3   : > { %v805_v35 = vpop.f32.mrf.mxu3 }
  0xe4   : > { %v811_v36 = vadd.f32 %v805_v35, %v777_v33 }
  0xe5   : > { %v702_v37 = vpop.f32.mrf.mxu0 }
  0xe6   : > { %v706_v14 = vadd.f32 %v702_v37, %v668_v27  ;;  %v880_v29 = vpop.f32.mrf.mxu1  ;;  %v1353_v27 = vstv %s2142_s25 }
  0xe7   : > { %v1038_v10 = vpop.f32.mrf.mxu2 }
  0xe8   : > { %v740_v26 = vadd.f32 %v736_v22, %v706_v14 }
  0xea   : > { %v778_v39 = vadd.f32 %v774_v46, %v740_v26 }
  0xeb   : > { %v808_v40 = vpop.f32.mrf.mxu3 }
  0xec   : > { %v812_v41 = vadd.f32 %v808_v40, %v778_v39 }
  0xed   : > { %v843_v42 = vpop.f32.mrf.mxu0 }
  0xee   : > { %v849_v43 = vadd.f32 %v843_v42, %v811_v36  ;;  %v1121_v52 = vpop.f32.mrf.mxu1 }
  0xef   : > { %v1150_v58 = vpop.f32.mrf.mxu2 }
  0xf0   : > { %v883_v44 = vadd.f32 %v877_v38, %v849_v43 }
  0xf2   : > { %v887_v54 = vmul.f32 %v886_v50, %v883_v44  ;;  %v1824_v44 = vstv %s2184_s26  ;;  %s2310_s26 = scalar_lea.hbm %s3020_s5, 128 }
  0xf3   : > { %v1010_v45 = vpop.f32.mrf.mxu3  ;;  %p2312_p4 = scmp.lt.s32.totalorder %s2310_s26, %s2306_s17 }
  0xf4   : > { %v1011_v19 = vadd.f32 %v1010_v45, %v987_v18  ;;  %v891_v61 = vadd.f32 %v890_v11, %v887_v54 }
  0xf5   : > { %v846_v47 = vpop.f32.mrf.mxu0  ;;  %p2313_p7 = por %p2312_p4, %p2311_p3 }
  0xf6   : > { %v850_v48 = vadd.f32 %v846_v47, %v812_v41  ;;  %v1041_v49 = vadd.f32 %v1038_v10, %v1011_v19  ;;  %v2099_v17 = vmul.f32 -1.442695, %v891_v61  ;;  %v1233_v28 = vpop.f32.mrf.mxu1 }
  0xf7   : > { %v1262_v4 = vpop.f32.mrf.mxu2  ;;  %p2314_p8 = pnand %p2313_p7, %p2309_p2 }
  0xf8   : > { %v884_v51 = vadd.f32 %v880_v29, %v850_v48 }
  0xfa   : > { %v888_v53 = vmul.f32 %v886_v50, %v884_v51 }
  0xfb   : > { %v1065_v55 = vpop.f32.mrf.mxu3 }
  0xfc   : > { %v1068_v56 = vadd.f32 %v1065_v55, %v1041_v49  ;;  %v892_v59 = vadd.f32 %v890_v11, %v888_v53 }
  0xfd   : > { %v1094_v57 = vpop.f32.mrf.mxu0 }
  0xfe   : > { %v1097_v60 = vadd.f32 %v1094_v57, %v1068_v56  ;;  %v2100_v63 = vmul.f32 -1.442695, %v892_v59  ;;  %v1345_v15 = vpop.f32.mrf.mxu1 }
 0x100   : > { %v1124_v62 = vadd.f32 %v1121_v52, %v1097_v60  ;;  %2251 = vpow2.f32 %v2100_v63 }
 0x101   : > { %2253 = vpow2.f32 %v2099_v17 }
 0x102   : > { %v1153_v0 = vadd.f32 %v1150_v58, %v1124_v62 }
 0x103   : > { %v1177_v1 = vpop.f32.mrf.mxu3 }
 0x104   : > { %v1180_v34 = vadd.f32 %v1177_v1, %v1153_v0 }
 0x105   : > { %v1206_v2 = vpop.f32.mrf.mxu0 }
 0x106   : > { %v1209_v3 = vadd.f32 %v1206_v2, %v1180_v34  ;;  %v2252_v8 = vpop.eup %2251 }
 0x107   : > { %v2254_v23 = vpop.eup %2253  ;;  %v900_v12 = vadd.f32 1.0, %v2252_v8 }
 0x108   : > { %v1236_v5 = vadd.f32 %v1233_v28, %v1209_v3  ;;  %v899_v21 = vadd.f32 1.0, %v2254_v23 }
 0x109   : > { %2255 = vrcp.f32 %v900_v12  ;;  %vm921_vm7 = vweird.f32 %v900_v12  ;;  %v927_v40 = vand.u32 2147483648, %v900_v12  ;;  %v925_v43 = vand.u32 2147483647, %v900_v12 }
 0x10a   : > { %v1265_v6 = vadd.f32 %v1262_v4, %v1236_v5  ;;  %2257 = vrcp.f32 %v899_v21  ;;  %vm906_vm9 = vweird.f32 %v899_v21  ;;  %v912_v29 = vand.u32 2147483648, %v899_v21 }
 0x10b   : > { %v1289_v7 = vpop.f32.mrf.mxu3  ;;  %v910_v19 = vand.u32 2147483647, %v899_v21  ;;  %v928_v49 = vor.u32 1.1754944e-38, %v927_v40  ;;  %vm926_vm15 = vcmp.eq.f32.partialorder %v925_v43, 8.507059e+37 }
 0x10c   : > { %v1292_v9 = vadd.f32 %v1289_v7, %v1265_v6  ;;  %v913_v52 = vor.u32 1.1754944e-38, %v912_v29 }
 0x10d   : > { %v1318_v13 = vpop.f32.mrf.mxu0  ;;  %vm911_vm2 = vcmp.eq.f32.partialorder %v910_v19, 8.507059e+37 }
 0x10e   : > { %v1321_v16 = vadd.f32 %v1318_v13, %v1292_v9 }
 0x10f   : > { %v2256_v31 = vpop.eup %2255 }
 0x110   : > { %v1348_v22 = vadd.f32 %v1345_v15, %v1321_v16  ;;  %v2258_v32 = vpop.eup %2257  ;;  %v917_v33 = vmul.f32 %v2256_v31, %v900_v12  ;;  %vm922_vm8 = vweird.f32 %v2256_v31 }
 0x111   : > { %v902_v35 = vmul.f32 %v2258_v32, %v899_v21  ;;  %vm907_vm10 = vweird.f32 %v2258_v32  ;;  %vm2921_vm11 = vmor %vm921_vm7, %vm922_vm8 }
 0x112   : > { %v1351_v24 = vmul.f32 %v1350_v20, %v1348_v22  ;;  %v918_v38 = vsub.f32 1.0, %v917_v33  ;;  %vm908_vm14 = vmor %vm906_vm9, %vm907_vm10 }
 0x113   : > { %v903_v14 = vsub.f32 1.0, %v902_v35 }
 0x114   : > { %v1354_v30 = vadd.f32 %v1353_v27, %v1351_v24  ;;  %v919_v26 = vmul.f32 %v2256_v31, %v918_v38 }
 0x115   : > { %v904_v18 = vmul.f32 %v2258_v32, %v903_v14 }
 0x116   : > { %v2143_v46 = vmul.f32 -1.442695, %v1354_v30  ;;  %v920_v42 = vadd.f32 %v2256_v31, %v919_v26 }
 0x117   : > { %v905_v10 = vadd.f32 %v2258_v32, %v904_v18  ;;  %v1871_v18 = vshrl.u32 %v1387_v25, 7 }
 0x118   : > { %2259 = vpow2.f32 %v2143_v46  ;;  %v924_v50 = vsel %vm2921_vm11, %v2256_v31, %v920_v42 }
 0x119   : > { %v909_v54 = vsel %vm908_vm14, %v2258_v32, %v905_v10  ;;  %v929_v11 = vsel %vm926_vm15, %v928_v49, %v924_v50  ;;  %2249 = vset.pattern.permute.xlu0 %v1871_v18  ;;  %2247 = vset.pattern.permute.xlu1 %v1871_v18  ;;  %v1827_v10 = vstv %s2185_s30 }
 0x11a   : > { %v914_v57 = vsel %vm911_vm2, %v913_v52, %v909_v54  ;;  %v932_v59 = vmul.f32 0.33333334, %v929_v11 }
 0x11b   : > { %v931_v61 = vmul.f32 0.33333334, %v914_v57 }
 0x11e   : > { %v2260_v36 = vpop.eup %2259 }
 0x11f   : > { %v1358_v37 = vadd.f32 1.0, %v2260_v36 }
 0x121   : > { %2261 = vrcp.f32 %v1358_v37  ;;  %v1370_v45 = vand.u32 2147483648, %v1358_v37  ;;  %vm1364_vm12 = vweird.f32 %v1358_v37  ;;  %v1368_v48 = vand.u32 2147483647, %v1358_v37 }
 0x123   : > { %v1371_v53 = vor.u32 1.1754944e-38, %v1370_v45  ;;  %vm1369_vm3 = vcmp.eq.f32.partialorder %v1368_v48, 8.507059e+37 }
 0x127   : > { %v2262_v39 = vpop.eup %2261 }
 0x128   : > { %v1360_v41 = vmul.f32 %v2262_v39, %v1358_v37  ;;  %vm1365_vm13 = vweird.f32 %v2262_v39 }
 0x129   : > { %vm1366_vm0 = vmor %vm1364_vm12, %vm1365_vm13 }
 0x12a   : > { %v1361_v47 = vsub.f32 1.0, %v1360_v41  ;;  %v1878_v41 = vadd.s32 8, %v1871_v18 }
 0x12c   : > { %v1362_v51 = vmul.f32 %v2262_v39, %v1361_v47  ;;  %2248 = vset.pattern.permute.xlu2 %v1878_v41 }
 0x12e   : > { %v1363_v55 = vadd.f32 %v2262_v39, %v1362_v51 }
 0x130   : > { %v1367_v56 = vsel %vm1366_vm0, %v2262_v39, %v1363_v55  ;;  %v1539_v15 = vpop.f32.mrf.mxu1 }
 0x131   : > { %v1372_v58 = vsel %vm1369_vm3, %v1371_v53, %v1367_v56 }
 0x132   : > { %v1374_v60 = vmul.f32 0.33333334, %v1372_v58 }
 0x134   : > { %v1853_v62 = vperm.slane %v1374_v60, 0  ;;  %v1850_v63 = vrot.slane %v1374_v60, 1  ;;  %v1851_v0 = vrot.slane %v1374_v60, 2  ;;  %v1852_v17 = vrot.slane %v1374_v60, 3 }
 0x135   : > { %v1461_v23 = vpop.f32.mrf.mxu2 }
 0x136   : > { %v2927_v1 = vadd.f32 %v1853_v62, %v932_v59  ;;  %v1854_v28 = vperm.slane %v1850_v63, 0  ;;  %v1855_v34 = vperm.slane %v1851_v0, 0  ;;  %v1856_v2 = vperm.slane %v1852_v17, 0 }
 0x137   : > { %v2929_v3 = vadd.f32 %v1853_v62, %v931_v61 }
 0x138   : > { %v2931_v4 = vadd.f32 %v1854_v28, %v932_v59  ;;  %v2933_v5 = vadd.f32 %v1855_v34, %v932_v59  ;;  %v2935_v6 = vadd.f32 %v1854_v28, %v931_v61  ;;  %v2937_v7 = vadd.f32 %v1856_v2, %v932_v59  ;;  %v1651_v31 = vpop.f32.mrf.mxu1  ;;  %v2267_v28 = vld [vmem:[%s2476_s11 + $0x8] sm:$0xff] }
 0x139   : > { %v2939_v8 = vadd.f32 %v1855_v34, %v931_v61  ;;  %v2941_v9 = vadd.f32 %v1856_v2, %v931_v61 }
 0x140   : > { %v1763_v39 = vpop.f32.mrf.mxu1 }
 0x147   : > { %v1512_v13 = vpop.f32.mrf.mxu0 }
 0x14c   : > { %v1484_v16 = vpop.f32.mrf.mxu3 }
 0x14d   : > { %v1485_v12 = vadd.f32 %v1484_v16, %v1461_v23 }
 0x14e   : > { %v1568_v20 = vpop.f32.mrf.mxu2 }
 0x14f   : > { %v1515_v21 = vadd.f32 %v1512_v13, %v1485_v12  ;;  %v1624_v24 = vpop.f32.mrf.mxu0  ;;  %v2268_v13 = vld [vmem:[%s2476_s11 + $0x18] sm:$0xff]  ;;  %v2269_v12 = vld [vmem:[%s2476_s11 + $0x28] sm:$0xff] }
 0x151   : > { %v1542_v22 = vadd.f32 %v1539_v15, %v1515_v21 }
 0x153   : > { %v1571_v27 = vadd.f32 %v1568_v20, %v1542_v22 }
 0x154   : > { %v1595_v30 = vpop.f32.mrf.mxu3 }
 0x155   : > { %v1598_v46 = vadd.f32 %v1595_v30, %v1571_v27 }
 0x156   : > { %v1680_v33 = vpop.f32.mrf.mxu2 }
 0x157   : > { %v1627_v32 = vadd.f32 %v1624_v24, %v1598_v46  ;;  %v1736_v14 = vpop.f32.mrf.mxu0 }
 0x159   : > { %v1654_v35 = vadd.f32 %v1651_v31, %v1627_v32  ;;  %v2271_v31 = vld [vmem:[%s2476_s11 + $0x38] sm:$0xff] }
 0x15b   : > { %v1683_v36 = vadd.f32 %v1680_v33, %v1654_v35  ;;  %v2272_v33 = vld [vmem:[%s2476_s11] sm:$0xff] }
 0x15c   : > { %v1707_v37 = vpop.f32.mrf.mxu3 }
 0x15d   : > { %v1710_v38 = vadd.f32 %v1707_v37, %v1683_v36 }
 0x15e   : > { %v1792_v42 = vpop.f32.mrf.mxu2 }
 0x15f   : > { %v1739_v26 = vadd.f32 %v1736_v14, %v1710_v38  ;;  %v2274_v14 = vld [vmem:[%s2476_s11 + $0x30] sm:$0xff] }
 0x161   : > { %v1766_v40 = vadd.f32 %v1763_v39, %v1739_v26 }
 0x163   : > { %v1795_v43 = vadd.f32 %v1792_v42, %v1766_v40 }
 0x164   : > { %v1819_v29 = vpop.f32.mrf.mxu3 }
 0x165   : > { %v1822_v45 = vadd.f32 %v1819_v29, %v1795_v43 }
 0x167   : > { %v1825_v19 = vmul.f32 %v1824_v44, %v1822_v45 }
 0x169   : > { %v1828_v47 = vadd.f32 %v1827_v10, %v1825_v19 }
 0x16b   : > { %v2186_v48 = vmul.f32 -1.442695, %v1828_v47 }
 0x16d   : > { %2263 = vpow2.f32 %v2186_v48 }
 0x173   : > { %v2264_v49 = vpop.eup %2263 }
 0x174   : > { %v1832_v50 = vadd.f32 1.0, %v2264_v49 }
 0x176   : > { %2265 = vrcp.f32 %v1832_v50  ;;  %v1844_v53 = vand.u32 2147483648, %v1832_v50  ;;  %v1842_v55 = vand.u32 2147483647, %v1832_v50  ;;  %vm1838_vm5 = vweird.f32 %v1832_v50 }
 0x178   : > { %v1845_v56 = vor.u32 1.1754944e-38, %v1844_v53  ;;  %vm1843_vm7 = vcmp.eq.f32.partialorder %v1842_v55, 8.507059e+37 }
 0x17c   : > { %v2266_v25 = vpop.eup %2265 }
 0x17d   : > { %v1834_v51 = vmul.f32 %v2266_v25, %v1832_v50  ;;  %vm1839_vm4 = vweird.f32 %v2266_v25 }
 0x17e   : > { %vm1840_vm6 = vmor %vm1838_vm5, %vm1839_vm4 }
 0x17f   : > { %v1835_v52 = vsub.f32 1.0, %v1834_v51 }
 0x181   : > { %v1836_v54 = vmul.f32 %v2266_v25, %v1835_v52 }
 0x183   : > { %v1837_v11 = vadd.f32 %v2266_v25, %v1836_v54 }
 0x185   : > { %v1841_v57 = vsel %vm1840_vm6, %v2266_v25, %v1837_v11 }
 0x186   : > { %v1846_v58 = vsel %vm1843_vm7, %v1845_v56, %v1841_v57 }
 0x187   : > { %v1848_v59 = vmul.f32 0.33333334, %v1846_v58 }
 0x189   : > { %v1882_v60 = vperm.slane %v1848_v59, 1  ;;  %v1869_v61 = vperm.slane %v1848_v59, 0  ;;  %v1895_v62 = vperm.slane %v1848_v59, 2  ;;  %v1908_v63 = vperm.slane %v1848_v59, 3 }
 0x18b   : > { %1887 = vperm.xlu0 %2249, %v1882_v60   ;;  %1880 = vperm.xlu2 %2248, %v1869_v61  }
 0x18c   : > { %1874 = vperm.xlu1 %2247, %v1869_v61  }
 0x193   : > { %1893 = vperm.xlu2 %2248, %v1882_v60   ;;  %2250 = vset.pattern.permute.xlu0 %v1878_v41 }
 0x194   : > { %1900 = vperm.xlu1 %2247, %v1895_v62  }
 0x19b   : > { %1906 = vperm.xlu2 %2248, %v1895_v62  }
 0x19c   : > { %1913 = vperm.xlu1 %2247, %v1908_v63  }
 0x1a3   : > { %1919 = vperm.xlu2 %2248, %v1908_v63  }
 0x1e5   : > { %v1881_v0 = vpop.permute.xlu2 %1880 }
 0x1e6   : > { %v1922_v17 = vadd.f32 %v1881_v0, %v2927_v1 }
 0x1e8   : > { %v1930_v34 = vmul.f32 %v2267_v28, %v1922_v17 }
 0x1ea   : > { %1938 = vst.msk [vmem:[%s2949_s8 + $0x8] sm:$0xff] %vm245_vm1, %v1930_v34 }
 0x1ed   : > { %v1894_v2 = vpop.permute.xlu2 %1893 }
 0x1ee   : > { %v1924_v23 = vadd.f32 %v1894_v2, %v2931_v4 }
 0x1f0   : > { %v1932_v15 = vmul.f32 %v2268_v13, %v1924_v23 }
 0x1f2   : > { %1940 = vst.msk [vmem:[%s2949_s8 + $0x18] sm:$0xff] %vm245_vm1, %v1932_v15 }
 0x1f5   : > { %v1907_v1 = vpop.permute.xlu2 %1906 }
 0x1f6   : > { %v1926_v16 = vadd.f32 %v1907_v1, %v2933_v5  ;;  %v2270_v5 = vld [vmem:[%s2476_s11 + $0x10] sm:$0xff] }
 0x1f8   : > { %v1934_v20 = vmul.f32 %v2269_v12, %v1926_v16 }
 0x1fa   : > { %1942 = vst.msk [vmem:[%s2949_s8 + $0x28] sm:$0xff] %vm245_vm1, %v1934_v20 }
 0x1fd   : > { %v1888_v21 = vpop.permute.xlu0 %1887  ;;  %v1920_v22 = vpop.permute.xlu2 %1919 }
 0x1fe   : > { %v1923_v4 = vadd.f32 %v1888_v21, %v2935_v6  ;;  %v1928_v27 = vadd.f32 %v1920_v22, %v2937_v7  ;;  %v1875_v24 = vpop.permute.xlu1 %1874 }
 0x1ff   : > { %v1921_v30 = vadd.f32 %v1875_v24, %v2929_v3  ;;  %v2273_v3 = vld [vmem:[%s2476_s11 + $0x20] sm:$0xff] }
 0x200   : > { %v1931_v46 = vmul.f32 %v2270_v5, %v1923_v4  ;;  %v1936_v32 = vmul.f32 %v2271_v31, %v1928_v27 }
 0x201   : > { %v1929_v35 = vmul.f32 %v2272_v33, %v1921_v30 }
 0x202   : > { %1939 = vst.msk [vmem:[%s2949_s8 + $0x10] sm:$0xff] %vm245_vm1, %v1931_v46 }
 0x203   : > { %1944 = vst.msk [vmem:[%s2949_s8 + $0x38] sm:$0xff] %vm245_vm1, %v1936_v32 }
 0x204   : > { %1937 = vst.msk [vmem:[%s2949_s8] sm:$0xff] %vm245_vm1, %v1929_v35 }
 0x206   : > { %v1901_v6 = vpop.permute.xlu1 %1900 }
 0x207   : > { %v1925_v7 = vadd.f32 %v1901_v6, %v2939_v8 }
 0x209   : > { %v1933_v36 = vmul.f32 %v2273_v3, %v1925_v7 }
 0x20b   : > { %1941 = vst.msk [vmem:[%s2949_s8 + $0x20] sm:$0xff] %vm245_vm1, %v1933_v36 }
 0x20e   : > { %v1914_v37 = vpop.permute.xlu1 %1913 }
 0x20f   : > { %v1927_v38 = vadd.f32 %v1914_v37, %v2941_v9 }
 0x211   : > { %v1935_v26 = vmul.f32 %v2274_v14, %v1927_v38 }
 0x213   : > { %1943 = vst.msk [vmem:[%s2949_s8 + $0x30] sm:$0xff] %vm245_vm1, %v1935_v26 }
 0x214   : > { %2317 = shalt.err (!%p2314_p8)
}
 0x215   : > { %s2360_s11 = smov 128   ;;  %s2361_s6 = smov 8  }
 0x216   : > { %2198 = dma.vmem_to_hbm [thread:$0]  (%p2430_p5), %s1959_s14, 1024, %s1961_s15, %s1946_s22, %s2360_s11, %s2360_s11, %s2361_s6  }
 0x217 PF: > { %p2210_p9 = scmp.ge.s32.totalorder %s2356_s21, 2  ;;  %s1975_s8 = sand.u32 1, %s2344_s18  }
 0x218   : > { %s1976_s9 = scalar_lea.sflag [#allocation6], %s1975_s8 }
 0x219   : > { %p2205_p10 = pnand %p2210_p9, %p2434_p6 }
 0x21b   : > { %p2206_p11 = pneg %p2205_p10 }
 0x21d   : > { %2339 = dma.done.wait (%p2206_p11), %s1976_s9, 1024  }
 0x21e   : > { %2341 = vsyncadd (%p2206_p11), %s1976_s9, 4294966272  ;;  %p16_p12 = scmp.ge.s32.totalorder %s2417_s24, 4   ;;  %s3025_s18 = smov %s2348_s19 }
 0x21f   : > { %s3026_s19 = smov %s2352_s20  ;;  %s3027_s20 = smov %s2428_s27 }
 0x220   : > { %s3028_s21 = smov %s2417_s24  ;;  %18 = sbr.rel (!%p16_p12) target bundleno = 4 (0x4), region = 122 }
 0x225   :  { %1982 = vsyncpa [#allocation6], 1 }
 0x226   :  { %1984 = vsyncpa [#allocation6 + $0x1], 1 }
 0x227   :  { %1985 = vsyncpa [#allocation7], 1 }
 0x228   :  { %1987 = vsyncpa [#allocation7 + $0x1], 1 }

</bundles_post_ra>
